<compile_context>
chip_gen: v7x
topology: tpu7x:2x2x1
jax: 0.10.0
libtpu: 0.0.40
codegen_flags: <defaults>
</compile_context>

<pallas_src>
import functools

import jax
import jax.numpy as jnp
from jax.experimental import pallas as pl
from jax.experimental.pallas import tpu as pltpu


# ----------------------------- Pallas kernel -------------------------------

def _shift_flat(a, off):
    """b[:, p] = a[:, p + off] if 0 <= p + off < HW else 0  (static off)."""
    if off == 0:
        return a
    c = a.shape[0]
    zeros = jnp.zeros((c, abs(off)), a.dtype)
    if off > 0:
        return jnp.concatenate([a[:, off:], zeros], axis=1)
    return jnp.concatenate([zeros, a[:, :off]], axis=1)


def _residual_block_kernel(x_ref, w1_ref, b1_ref, w2_ref, b2_ref, ww_ref,
                           out_ref, chain_ref, *, H, W):
    """Fused ResidualBlock for one batch element.

    x_ref     : (1, C, H*W)      VMEM   (NCHW image, spatial dims flattened)
    w{1,2}_ref: (Cout, 9*Cin)    VMEM   col index = (kh*3+kw)*Cin + ci
    b{1,2}_ref: (Cout, 1)        VMEM
    ww_ref    : (1, H*W) int32   VMEM   column index (p mod W) per position
    out_ref   : (1, C, H*W)      VMEM   relu(x)  -- module's return value
    chain_ref : (1, C, H*W)      VMEM   conv2(relu(conv1(x))) + x (discarded
                                        by the module; emitted for validation)
    """
    HW = H * W
    x = x_ref[0].astype(jnp.float32)          # (C, HW), lanes = HW (dense)
    ww = ww_ref[...]                          # (1, HW) int32

    def conv3x3(inp, w_mat, bias):
        # inp: (Cin, HW) f32, w_mat: (Cout, 9*Cin) f32, bias: (Cout, 1) f32
        cin = inp.shape[0]
        cout = w_mat.shape[0]
        acc = jnp.zeros((cout, HW), jnp.float32)
        for kh in range(3):
            for kw in range(3):
                dh, dw = kh - 1, kw - 1
                # Shifted window in flattened (row-major) space; out-of-image
                # pixels become zeros (zero-fill at the ends + column mask).
                tap = _shift_flat(inp, dh * W + dw)          # (Cin, HW)
                if dw == -1:
                    tap = jnp.where(ww >= 1, tap, 0.0)       # drop col 0 wrap
                elif dw == 1:
                    tap = jnp.where(ww < W - 1, tap, 0.0)    # drop col W-1 wrap
                t = kh * 3 + kw
                # VPU broadcast-FMAs: (Cout,1) x (1,HW) -> (Cout,HW)
                for ci in range(cin):
                    col = t * cin + ci
                    wcol = w_mat[:, col:col + 1]             # (Cout, 1)
                    acc = acc + wcol * tap[ci:ci + 1, :]
        return acc + bias

    w1 = w1_ref[...].astype(jnp.float32)
    w2 = w2_ref[...].astype(jnp.float32)
    b1 = b1_ref[...].astype(jnp.float32)
    b2 = b2_ref[...].astype(jnp.float32)

    h = jnp.maximum(conv3x3(x, w1, b1), 0.0)   # out = relu(conv1(x))
    h = conv3x3(h, w2, b2) + x                 # out = conv2(out); out += x
    chain_ref[0] = h.astype(chain_ref.dtype)
    # NOTE: reference then does `out = self.relu(x)`, discarding `h`.
    out_ref[0] = jnp.maximum(x, 0.0).astype(out_ref.dtype)


# ------------------------------ wrapper -------------------------------------

def residual_block_forward(x, params):
    """x: (N, C, H, W) NCHW, exactly like the PyTorch module.

    Returns (out, chain):
      out   -- the module's return value (== relu(x) due to the rebinding)
      chain -- the conv chain the module computes and discards (for checks).
    Runs as ONE fused Pallas kernel, grid over batch.
    """
    N, C, H, W = x.shape
    HW = H * W
    w1, b1 = params["w1"], params["b1"]
    w2, b2 = params["w2"], params["b2"]
    Cout = w1.shape[0]
    assert w1.shape == (Cout, C, 3, 3) and w2.shape == (Cout, Cout, 3, 3)
    assert Cout == C, "residual add requires out_c == in_c"

    # Contiguous (free) reshape; channels on sublanes, H*W on the lane axis.
    x_flat = x.reshape(N, C, HW)
    # PyTorch (O,I,3,3) -> (O, kh, kw, I) -> (O, 9*I); col = (kh*3+kw)*I + i.
    w1_mat = jnp.transpose(w1, (0, 2, 3, 1)).reshape(Cout, 9 * C)
    w2_mat = jnp.transpose(w2, (0, 2, 3, 1)).reshape(Cout, 9 * Cout)
    b1_col = b1.reshape(Cout, 1)
    b2_col = b2.reshape(Cout, 1)
    # Per-position column index, used for boundary masking inside the kernel.
    ww = (jnp.arange(HW, dtype=jnp.int32) % W).reshape(1, HW)

    kernel = functools.partial(_residual_block_kernel, H=H, W=W)
    out_flat, chain_flat = pl.pallas_call(
        kernel,
        out_shape=(
            jax.ShapeDtypeStruct((N, C, HW), x.dtype),
            jax.ShapeDtypeStruct((N, C, HW), x.dtype),
        ),
        grid=(N,),
        in_specs=[
            pl.BlockSpec((1, C, HW), lambda n: (n, 0, 0)),
            pl.BlockSpec((Cout, 9 * C), lambda n: (0, 0)),
            pl.BlockSpec((Cout, 1), lambda n: (0, 0)),
            pl.BlockSpec((Cout, 9 * Cout), lambda n: (0, 0)),
            pl.BlockSpec((Cout, 1), lambda n: (0, 0)),
            pl.BlockSpec((1, HW), lambda n: (0, 0)),
        ],
        out_specs=(
            pl.BlockSpec((1, C, HW), lambda n: (n, 0, 0)),
            pl.BlockSpec((1, C, HW), lambda n: (n, 0, 0)),
        ),
        compiler_params=pltpu.CompilerParams(
            dimension_semantics=("parallel",)),
    )(x_flat, w1_mat, b1_col, w2_mat, b2_col, ww)

    return out_flat.reshape(N, C, H, W), chain_flat.reshape(N, C, H, W)


def init_params(in_c, out_c, key):
    """Deterministic synthetic params; PyTorch conv weight layout (O,I,3,3)."""
    k1, k2, k3, k4 = jax.random.split(key, 4)
    w1 = jax.random.normal(k1, (out_c, in_c, 3, 3), jnp.float32) * 0.1
    b1 = jax.random.normal(k2, (out_c,), jnp.float32) * 0.1
    w2 = jax.random.normal(k3, (out_c, out_c, 3, 3), jnp.float32) * 0.1
    b2 = jax.random.normal(k4, (out_c,), jnp.float32) * 0.1
    return {"w1": w1, "b1": b1, "w2": w2, "b2": b2}


if __name__ == "__main__":
    key = jax.random.PRNGKey(0)
    kx, kp = jax.random.split(key)

    N, C, H, W = 2, 4, 16, 16
    x = jax.random.normal(kx, (N, C, H, W), jnp.float32)
    params = init_params(C, C, kp)

    out, chain = jax.jit(residual_block_forward)(x, params)
    jax.block_until_ready((out, chain))

    # 1) The module's return value is exactly relu(x).
    assert out.shape == (N, C, H, W)
    assert jnp.allclose(out, jnp.maximum(x, 0.0), atol=1e-6)

    # 2) Validate the (discarded-by-the-module) conv chain against lax.conv.
    def conv_ref(t, w, b):
        y = jax.lax.conv_general_dilated(
            t, w, window_strides=(1, 1), padding=((1, 1), (1, 1)),
            dimension_numbers=("NCHW", "OIHW", "NCHW"))
        return y + b.reshape(1, -1, 1, 1)

    h_ref = jnp.maximum(conv_ref(x, params["w1"], params["b1"]), 0.0)
    h_ref = conv_ref(h_ref, params["w2"], params["b2"]) + x
    assert jnp.allclose(chain, h_ref, atol=1e-4, rtol=1e-4)

    print("KERNEL_OK")
</pallas_src>

<mosaic_0001>
module attributes {stable_mosaic.version = 11 : i64} {
  func.func @_residual_block_kernel(%arg0: i32, %arg1: memref<1x4x256xf32, #tpu.memory_space<vmem>>, %arg2: memref<4x36xf32, #tpu.memory_space<vmem>>, %arg3: memref<4x1xf32, #tpu.memory_space<vmem>>, %arg4: memref<4x36xf32, #tpu.memory_space<vmem>>, %arg5: memref<4x1xf32, #tpu.memory_space<vmem>>, %arg6: memref<1x256xi32, #tpu.memory_space<vmem>>, %arg7: memref<1x4x256xf32, #tpu.memory_space<vmem>>, %arg8: memref<1x4x256xf32, #tpu.memory_space<vmem>>) attributes {dimension_semantics = [#tpu.dimension_semantics<parallel>], iteration_bounds = array<i64: 2>, scalar_prefetch = 0 : i64, scratch_operands = 0 : i64, tpu.core_type = #tpu.core_type<tc>, window_params = [{transform_indices = @transform_0, window_bounds = array<i64: 1, 4, 256>}, {pipeline_mode = #tpu.pipeline_mode<synchronous>, transform_indices = @transform_1, window_bounds = array<i64: 4, 36>}, {pipeline_mode = #tpu.pipeline_mode<synchronous>, transform_indices = @transform_2, window_bounds = array<i64: 4, 1>}, {pipeline_mode = #tpu.pipeline_mode<synchronous>, transform_indices = @transform_3, window_bounds = array<i64: 4, 36>}, {pipeline_mode = #tpu.pipeline_mode<synchronous>, transform_indices = @transform_4, window_bounds = array<i64: 4, 1>}, {pipeline_mode = #tpu.pipeline_mode<synchronous>, transform_indices = @transform_5, window_bounds = array<i64: 1, 256>}, {transform_indices = @transform_6, window_bounds = array<i64: 1, 4, 256>}, {transform_indices = @transform_7, window_bounds = array<i64: 1, 4, 256>}]} {
    %c0 = arith.constant 0 : index
    %c0_0 = arith.constant 0 : index
    %c0_1 = arith.constant 0 : index
    %0 = vector.load %arg1[%c0, %c0_0, %c0_1] : memref<1x4x256xf32, #tpu.memory_space<vmem>>, vector<1x4x256xf32>
    %1 = vector.shape_cast %0 : vector<1x4x256xf32> to vector<4x256xf32>
    %c0_2 = arith.constant 0 : index
    %c0_3 = arith.constant 0 : index
    %2 = vector.load %arg6[%c0_2, %c0_3] : memref<1x256xi32, #tpu.memory_space<vmem>>, vector<1x256xi32>
    %c0_4 = arith.constant 0 : index
    %c0_5 = arith.constant 0 : index
    %3 = vector.load %arg2[%c0_4, %c0_5] : memref<4x36xf32, #tpu.memory_space<vmem>>, vector<4x36xf32>
    %c0_6 = arith.constant 0 : index
    %c0_7 = arith.constant 0 : index
    %4 = vector.load %arg4[%c0_6, %c0_7] : memref<4x36xf32, #tpu.memory_space<vmem>>, vector<4x36xf32>
    %c0_8 = arith.constant 0 : index
    %c0_9 = arith.constant 0 : index
    %5 = vector.load %arg3[%c0_8, %c0_9] : memref<4x1xf32, #tpu.memory_space<vmem>>, vector<4x1xf32>
    %c0_10 = arith.constant 0 : index
    %c0_11 = arith.constant 0 : index
    %6 = vector.load %arg5[%c0_10, %c0_11] : memref<4x1xf32, #tpu.memory_space<vmem>>, vector<4x1xf32>
    %cst = arith.constant 0.000000e+00 : f32
    %7 = vector.broadcast %cst : f32 to vector<4x256xf32>
    %cst_12 = arith.constant 0.000000e+00 : f32
    %8 = vector.broadcast %cst_12 : f32 to vector<4x17xf32>
    %9 = vector.extract_strided_slice %1 {offsets = [0, 0], sizes = [4, 239], strides = [1, 1]} : vector<4x256xf32> to vector<4x239xf32>
    %10 = tpu.concatenate %8, %9 in 1 : vector<4x17xf32>, vector<4x239xf32> -> vector<4x256xf32>
    %c1_i32 = arith.constant 1 : i32
    %11 = vector.broadcast %c1_i32 : i32 to vector<1x256xi32>
    %12 = arith.cmpi sge, %2, %11 : vector<1x256xi32>
    %cst_13 = arith.constant 0.000000e+00 : f32
    %13 = vector.shape_cast %12 : vector<1x256xi1> to vector<1x256xi1>
    %14 = vector.broadcast %13 : vector<1x256xi1> to vector<4x256xi1>
    %15 = vector.broadcast %cst_13 : f32 to vector<4x256xf32>
    %16 = arith.select %14, %10, %15 : vector<4x256xi1>, vector<4x256xf32>
    %17 = vector.extract_strided_slice %3 {offsets = [0, 0], sizes = [4, 1], strides = [1, 1]} : vector<4x36xf32> to vector<4x1xf32>
    %18 = vector.extract_strided_slice %16 {offsets = [0, 0], sizes = [1, 256], strides = [1, 1]} : vector<4x256xf32> to vector<1x256xf32>
    %19 = vector.broadcast %17 : vector<4x1xf32> to vector<4x256xf32>
    %20 = vector.broadcast %18 : vector<1x256xf32> to vector<4x256xf32>
    %21 = arith.mulf %19, %20 : vector<4x256xf32>
    %22 = arith.addf %7, %21 : vector<4x256xf32>
    %23 = vector.extract_strided_slice %3 {offsets = [0, 1], sizes = [4, 1], strides = [1, 1]} : vector<4x36xf32> to vector<4x1xf32>
    %24 = vector.extract_strided_slice %16 {offsets = [1, 0], sizes = [1, 256], strides = [1, 1]} : vector<4x256xf32> to vector<1x256xf32>
    %25 = vector.broadcast %23 : vector<4x1xf32> to vector<4x256xf32>
    %26 = vector.broadcast %24 : vector<1x256xf32> to vector<4x256xf32>
    %27 = arith.mulf %25, %26 : vector<4x256xf32>
    %28 = arith.addf %22, %27 : vector<4x256xf32>
    %29 = vector.extract_strided_slice %3 {offsets = [0, 2], sizes = [4, 1], strides = [1, 1]} : vector<4x36xf32> to vector<4x1xf32>
    %30 = vector.extract_strided_slice %16 {offsets = [2, 0], sizes = [1, 256], strides = [1, 1]} : vector<4x256xf32> to vector<1x256xf32>
    %31 = vector.broadcast %29 : vector<4x1xf32> to vector<4x256xf32>
    %32 = vector.broadcast %30 : vector<1x256xf32> to vector<4x256xf32>
    %33 = arith.mulf %31, %32 : vector<4x256xf32>
    %34 = arith.addf %28, %33 : vector<4x256xf32>
    %35 = vector.extract_strided_slice %3 {offsets = [0, 3], sizes = [4, 1], strides = [1, 1]} : vector<4x36xf32> to vector<4x1xf32>
    %36 = vector.extract_strided_slice %16 {offsets = [3, 0], sizes = [1, 256], strides = [1, 1]} : vector<4x256xf32> to vector<1x256xf32>
    %37 = vector.broadcast %35 : vector<4x1xf32> to vector<4x256xf32>
    %38 = vector.broadcast %36 : vector<1x256xf32> to vector<4x256xf32>
    %39 = arith.mulf %37, %38 : vector<4x256xf32>
    %40 = arith.addf %34, %39 : vector<4x256xf32>
    %cst_14 = arith.constant 0.000000e+00 : f32
    %41 = vector.broadcast %cst_14 : f32 to vector<4x16xf32>
    %42 = vector.extract_strided_slice %1 {offsets = [0, 0], sizes = [4, 240], strides = [1, 1]} : vector<4x256xf32> to vector<4x240xf32>
    %43 = tpu.concatenate %41, %42 in 1 : vector<4x16xf32>, vector<4x240xf32> -> vector<4x256xf32>
    %44 = vector.extract_strided_slice %3 {offsets = [0, 4], sizes = [4, 1], strides = [1, 1]} : vector<4x36xf32> to vector<4x1xf32>
    %45 = vector.extract_strided_slice %43 {offsets = [0, 0], sizes = [1, 256], strides = [1, 1]} : vector<4x256xf32> to vector<1x256xf32>
    %46 = vector.broadcast %44 : vector<4x1xf32> to vector<4x256xf32>
    %47 = vector.broadcast %45 : vector<1x256xf32> to vector<4x256xf32>
    %48 = arith.mulf %46, %47 : vector<4x256xf32>
    %49 = arith.addf %40, %48 : vector<4x256xf32>
    %50 = vector.extract_strided_slice %3 {offsets = [0, 5], sizes = [4, 1], strides = [1, 1]} : vector<4x36xf32> to vector<4x1xf32>
    %51 = vector.extract_strided_slice %43 {offsets = [1, 0], sizes = [1, 256], strides = [1, 1]} : vector<4x256xf32> to vector<1x256xf32>
    %52 = vector.broadcast %50 : vector<4x1xf32> to vector<4x256xf32>
    %53 = vector.broadcast %51 : vector<1x256xf32> to vector<4x256xf32>
    %54 = arith.mulf %52, %53 : vector<4x256xf32>
    %55 = arith.addf %49, %54 : vector<4x256xf32>
    %56 = vector.extract_strided_slice %3 {offsets = [0, 6], sizes = [4, 1], strides = [1, 1]} : vector<4x36xf32> to vector<4x1xf32>
    %57 = vector.extract_strided_slice %43 {offsets = [2, 0], sizes = [1, 256], strides = [1, 1]} : vector<4x256xf32> to vector<1x256xf32>
    %58 = vector.broadcast %56 : vector<4x1xf32> to vector<4x256xf32>
    %59 = vector.broadcast %57 : vector<1x256xf32> to vector<4x256xf32>
    %60 = arith.mulf %58, %59 : vector<4x256xf32>
    %61 = arith.addf %55, %60 : vector<4x256xf32>
    %62 = vector.extract_strided_slice %3 {offsets = [0, 7], sizes = [4, 1], strides = [1, 1]} : vector<4x36xf32> to vector<4x1xf32>
    %63 = vector.extract_strided_slice %43 {offsets = [3, 0], sizes = [1, 256], strides = [1, 1]} : vector<4x256xf32> to vector<1x256xf32>
    %64 = vector.broadcast %62 : vector<4x1xf32> to vector<4x256xf32>
    %65 = vector.broadcast %63 : vector<1x256xf32> to vector<4x256xf32>
    %66 = arith.mulf %64, %65 : vector<4x256xf32>
    %67 = arith.addf %61, %66 : vector<4x256xf32>
    %cst_15 = arith.constant 0.000000e+00 : f32
    %68 = vector.broadcast %cst_15 : f32 to vector<4x15xf32>
    %69 = vector.extract_strided_slice %1 {offsets = [0, 0], sizes = [4, 241], strides = [1, 1]} : vector<4x256xf32> to vector<4x241xf32>
    %70 = tpu.concatenate %68, %69 in 1 : vector<4x15xf32>, vector<4x241xf32> -> vector<4x256xf32>
    %c15_i32 = arith.constant 15 : i32
    %71 = vector.broadcast %c15_i32 : i32 to vector<1x256xi32>
    %72 = arith.cmpi slt, %2, %71 : vector<1x256xi32>
    %cst_16 = arith.constant 0.000000e+00 : f32
    %73 = vector.shape_cast %72 : vector<1x256xi1> to vector<1x256xi1>
    %74 = vector.broadcast %73 : vector<1x256xi1> to vector<4x256xi1>
    %75 = vector.broadcast %cst_16 : f32 to vector<4x256xf32>
    %76 = arith.select %74, %70, %75 : vector<4x256xi1>, vector<4x256xf32>
    %77 = vector.extract_strided_slice %3 {offsets = [0, 8], sizes = [4, 1], strides = [1, 1]} : vector<4x36xf32> to vector<4x1xf32>
    %78 = vector.extract_strided_slice %76 {offsets = [0, 0], sizes = [1, 256], strides = [1, 1]} : vector<4x256xf32> to vector<1x256xf32>
    %79 = vector.broadcast %77 : vector<4x1xf32> to vector<4x256xf32>
    %80 = vector.broadcast %78 : vector<1x256xf32> to vector<4x256xf32>
    %81 = arith.mulf %79, %80 : vector<4x256xf32>
    %82 = arith.addf %67, %81 : vector<4x256xf32>
    %83 = vector.extract_strided_slice %3 {offsets = [0, 9], sizes = [4, 1], strides = [1, 1]} : vector<4x36xf32> to vector<4x1xf32>
    %84 = vector.extract_strided_slice %76 {offsets = [1, 0], sizes = [1, 256], strides = [1, 1]} : vector<4x256xf32> to vector<1x256xf32>
    %85 = vector.broadcast %83 : vector<4x1xf32> to vector<4x256xf32>
    %86 = vector.broadcast %84 : vector<1x256xf32> to vector<4x256xf32>
    %87 = arith.mulf %85, %86 : vector<4x256xf32>
    %88 = arith.addf %82, %87 : vector<4x256xf32>
    %89 = vector.extract_strided_slice %3 {offsets = [0, 10], sizes = [4, 1], strides = [1, 1]} : vector<4x36xf32> to vector<4x1xf32>
    %90 = vector.extract_strided_slice %76 {offsets = [2, 0], sizes = [1, 256], strides = [1, 1]} : vector<4x256xf32> to vector<1x256xf32>
    %91 = vector.broadcast %89 : vector<4x1xf32> to vector<4x256xf32>
    %92 = vector.broadcast %90 : vector<1x256xf32> to vector<4x256xf32>
    %93 = arith.mulf %91, %92 : vector<4x256xf32>
    %94 = arith.addf %88, %93 : vector<4x256xf32>
    %95 = vector.extract_strided_slice %3 {offsets = [0, 11], sizes = [4, 1], strides = [1, 1]} : vector<4x36xf32> to vector<4x1xf32>
    %96 = vector.extract_strided_slice %76 {offsets = [3, 0], sizes = [1, 256], strides = [1, 1]} : vector<4x256xf32> to vector<1x256xf32>
    %97 = vector.broadcast %95 : vector<4x1xf32> to vector<4x256xf32>
    %98 = vector.broadcast %96 : vector<1x256xf32> to vector<4x256xf32>
    %99 = arith.mulf %97, %98 : vector<4x256xf32>
    %100 = arith.addf %94, %99 : vector<4x256xf32>
    %cst_17 = arith.constant 0.000000e+00 : f32
    %101 = vector.broadcast %cst_17 : f32 to vector<4x1xf32>
    %102 = vector.extract_strided_slice %1 {offsets = [0, 0], sizes = [4, 255], strides = [1, 1]} : vector<4x256xf32> to vector<4x255xf32>
    %103 = tpu.concatenate %101, %102 in 1 : vector<4x1xf32>, vector<4x255xf32> -> vector<4x256xf32>
    %c1_i32_18 = arith.constant 1 : i32
    %104 = vector.broadcast %c1_i32_18 : i32 to vector<1x256xi32>
    %105 = arith.cmpi sge, %2, %104 : vector<1x256xi32>
    %cst_19 = arith.constant 0.000000e+00 : f32
    %106 = vector.shape_cast %105 : vector<1x256xi1> to vector<1x256xi1>
    %107 = vector.broadcast %106 : vector<1x256xi1> to vector<4x256xi1>
    %108 = vector.broadcast %cst_19 : f32 to vector<4x256xf32>
    %109 = arith.select %107, %103, %108 : vector<4x256xi1>, vector<4x256xf32>
    %110 = vector.extract_strided_slice %3 {offsets = [0, 12], sizes = [4, 1], strides = [1, 1]} : vector<4x36xf32> to vector<4x1xf32>
    %111 = vector.extract_strided_slice %109 {offsets = [0, 0], sizes = [1, 256], strides = [1, 1]} : vector<4x256xf32> to vector<1x256xf32>
    %112 = vector.broadcast %110 : vector<4x1xf32> to vector<4x256xf32>
    %113 = vector.broadcast %111 : vector<1x256xf32> to vector<4x256xf32>
    %114 = arith.mulf %112, %113 : vector<4x256xf32>
    %115 = arith.addf %100, %114 : vector<4x256xf32>
    %116 = vector.extract_strided_slice %3 {offsets = [0, 13], sizes = [4, 1], strides = [1, 1]} : vector<4x36xf32> to vector<4x1xf32>
    %117 = vector.extract_strided_slice %109 {offsets = [1, 0], sizes = [1, 256], strides = [1, 1]} : vector<4x256xf32> to vector<1x256xf32>
    %118 = vector.broadcast %116 : vector<4x1xf32> to vector<4x256xf32>
    %119 = vector.broadcast %117 : vector<1x256xf32> to vector<4x256xf32>
    %120 = arith.mulf %118, %119 : vector<4x256xf32>
    %121 = arith.addf %115, %120 : vector<4x256xf32>
    %122 = vector.extract_strided_slice %3 {offsets = [0, 14], sizes = [4, 1], strides = [1, 1]} : vector<4x36xf32> to vector<4x1xf32>
    %123 = vector.extract_strided_slice %109 {offsets = [2, 0], sizes = [1, 256], strides = [1, 1]} : vector<4x256xf32> to vector<1x256xf32>
    %124 = vector.broadcast %122 : vector<4x1xf32> to vector<4x256xf32>
    %125 = vector.broadcast %123 : vector<1x256xf32> to vector<4x256xf32>
    %126 = arith.mulf %124, %125 : vector<4x256xf32>
    %127 = arith.addf %121, %126 : vector<4x256xf32>
    %128 = vector.extract_strided_slice %3 {offsets = [0, 15], sizes = [4, 1], strides = [1, 1]} : vector<4x36xf32> to vector<4x1xf32>
    %129 = vector.extract_strided_slice %109 {offsets = [3, 0], sizes = [1, 256], strides = [1, 1]} : vector<4x256xf32> to vector<1x256xf32>
    %130 = vector.broadcast %128 : vector<4x1xf32> to vector<4x256xf32>
    %131 = vector.broadcast %129 : vector<1x256xf32> to vector<4x256xf32>
    %132 = arith.mulf %130, %131 : vector<4x256xf32>
    %133 = arith.addf %127, %132 : vector<4x256xf32>
    %134 = vector.extract_strided_slice %3 {offsets = [0, 16], sizes = [4, 1], strides = [1, 1]} : vector<4x36xf32> to vector<4x1xf32>
    %135 = vector.extract_strided_slice %1 {offsets = [0, 0], sizes = [1, 256], strides = [1, 1]} : vector<4x256xf32> to vector<1x256xf32>
    %136 = vector.broadcast %134 : vector<4x1xf32> to vector<4x256xf32>
    %137 = vector.broadcast %135 : vector<1x256xf32> to vector<4x256xf32>
    %138 = arith.mulf %136, %137 : vector<4x256xf32>
    %139 = arith.addf %133, %138 : vector<4x256xf32>
    %140 = vector.extract_strided_slice %3 {offsets = [0, 17], sizes = [4, 1], strides = [1, 1]} : vector<4x36xf32> to vector<4x1xf32>
    %141 = vector.extract_strided_slice %1 {offsets = [1, 0], sizes = [1, 256], strides = [1, 1]} : vector<4x256xf32> to vector<1x256xf32>
    %142 = vector.broadcast %140 : vector<4x1xf32> to vector<4x256xf32>
    %143 = vector.broadcast %141 : vector<1x256xf32> to vector<4x256xf32>
    %144 = arith.mulf %142, %143 : vector<4x256xf32>
    %145 = arith.addf %139, %144 : vector<4x256xf32>
    %146 = vector.extract_strided_slice %3 {offsets = [0, 18], sizes = [4, 1], strides = [1, 1]} : vector<4x36xf32> to vector<4x1xf32>
    %147 = vector.extract_strided_slice %1 {offsets = [2, 0], sizes = [1, 256], strides = [1, 1]} : vector<4x256xf32> to vector<1x256xf32>
    %148 = vector.broadcast %146 : vector<4x1xf32> to vector<4x256xf32>
    %149 = vector.broadcast %147 : vector<1x256xf32> to vector<4x256xf32>
    %150 = arith.mulf %148, %149 : vector<4x256xf32>
    %151 = arith.addf %145, %150 : vector<4x256xf32>
    %152 = vector.extract_strided_slice %3 {offsets = [0, 19], sizes = [4, 1], strides = [1, 1]} : vector<4x36xf32> to vector<4x1xf32>
    %153 = vector.extract_strided_slice %1 {offsets = [3, 0], sizes = [1, 256], strides = [1, 1]} : vector<4x256xf32> to vector<1x256xf32>
    %154 = vector.broadcast %152 : vector<4x1xf32> to vector<4x256xf32>
    %155 = vector.broadcast %153 : vector<1x256xf32> to vector<4x256xf32>
    %156 = arith.mulf %154, %155 : vector<4x256xf32>
    %157 = arith.addf %151, %156 : vector<4x256xf32>
    %cst_20 = arith.constant 0.000000e+00 : f32
    %158 = vector.broadcast %cst_20 : f32 to vector<4x1xf32>
    %159 = vector.extract_strided_slice %1 {offsets = [0, 1], sizes = [4, 255], strides = [1, 1]} : vector<4x256xf32> to vector<4x255xf32>
    %160 = tpu.concatenate %159, %158 in 1 : vector<4x255xf32>, vector<4x1xf32> -> vector<4x256xf32>
    %c15_i32_21 = arith.constant 15 : i32
    %161 = vector.broadcast %c15_i32_21 : i32 to vector<1x256xi32>
    %162 = arith.cmpi slt, %2, %161 : vector<1x256xi32>
    %cst_22 = arith.constant 0.000000e+00 : f32
    %163 = vector.shape_cast %162 : vector<1x256xi1> to vector<1x256xi1>
    %164 = vector.broadcast %163 : vector<1x256xi1> to vector<4x256xi1>
    %165 = vector.broadcast %cst_22 : f32 to vector<4x256xf32>
    %166 = arith.select %164, %160, %165 : vector<4x256xi1>, vector<4x256xf32>
    %167 = vector.extract_strided_slice %3 {offsets = [0, 20], sizes = [4, 1], strides = [1, 1]} : vector<4x36xf32> to vector<4x1xf32>
    %168 = vector.extract_strided_slice %166 {offsets = [0, 0], sizes = [1, 256], strides = [1, 1]} : vector<4x256xf32> to vector<1x256xf32>
    %169 = vector.broadcast %167 : vector<4x1xf32> to vector<4x256xf32>
    %170 = vector.broadcast %168 : vector<1x256xf32> to vector<4x256xf32>
    %171 = arith.mulf %169, %170 : vector<4x256xf32>
    %172 = arith.addf %157, %171 : vector<4x256xf32>
    %173 = vector.extract_strided_slice %3 {offsets = [0, 21], sizes = [4, 1], strides = [1, 1]} : vector<4x36xf32> to vector<4x1xf32>
    %174 = vector.extract_strided_slice %166 {offsets = [1, 0], sizes = [1, 256], strides = [1, 1]} : vector<4x256xf32> to vector<1x256xf32>
    %175 = vector.broadcast %173 : vector<4x1xf32> to vector<4x256xf32>
    %176 = vector.broadcast %174 : vector<1x256xf32> to vector<4x256xf32>
    %177 = arith.mulf %175, %176 : vector<4x256xf32>
    %178 = arith.addf %172, %177 : vector<4x256xf32>
    %179 = vector.extract_strided_slice %3 {offsets = [0, 22], sizes = [4, 1], strides = [1, 1]} : vector<4x36xf32> to vector<4x1xf32>
    %180 = vector.extract_strided_slice %166 {offsets = [2, 0], sizes = [1, 256], strides = [1, 1]} : vector<4x256xf32> to vector<1x256xf32>
    %181 = vector.broadcast %179 : vector<4x1xf32> to vector<4x256xf32>
    %182 = vector.broadcast %180 : vector<1x256xf32> to vector<4x256xf32>
    %183 = arith.mulf %181, %182 : vector<4x256xf32>
    %184 = arith.addf %178, %183 : vector<4x256xf32>
    %185 = vector.extract_strided_slice %3 {offsets = [0, 23], sizes = [4, 1], strides = [1, 1]} : vector<4x36xf32> to vector<4x1xf32>
    %186 = vector.extract_strided_slice %166 {offsets = [3, 0], sizes = [1, 256], strides = [1, 1]} : vector<4x256xf32> to vector<1x256xf32>
    %187 = vector.broadcast %185 : vector<4x1xf32> to vector<4x256xf32>
    %188 = vector.broadcast %186 : vector<1x256xf32> to vector<4x256xf32>
    %189 = arith.mulf %187, %188 : vector<4x256xf32>
    %190 = arith.addf %184, %189 : vector<4x256xf32>
    %cst_23 = arith.constant 0.000000e+00 : f32
    %191 = vector.broadcast %cst_23 : f32 to vector<4x15xf32>
    %192 = vector.extract_strided_slice %1 {offsets = [0, 15], sizes = [4, 241], strides = [1, 1]} : vector<4x256xf32> to vector<4x241xf32>
    %193 = tpu.concatenate %192, %191 in 1 : vector<4x241xf32>, vector<4x15xf32> -> vector<4x256xf32>
    %c1_i32_24 = arith.constant 1 : i32
    %194 = vector.broadcast %c1_i32_24 : i32 to vector<1x256xi32>
    %195 = arith.cmpi sge, %2, %194 : vector<1x256xi32>
    %cst_25 = arith.constant 0.000000e+00 : f32
    %196 = vector.shape_cast %195 : vector<1x256xi1> to vector<1x256xi1>
    %197 = vector.broadcast %196 : vector<1x256xi1> to vector<4x256xi1>
    %198 = vector.broadcast %cst_25 : f32 to vector<4x256xf32>
    %199 = arith.select %197, %193, %198 : vector<4x256xi1>, vector<4x256xf32>
    %200 = vector.extract_strided_slice %3 {offsets = [0, 24], sizes = [4, 1], strides = [1, 1]} : vector<4x36xf32> to vector<4x1xf32>
    %201 = vector.extract_strided_slice %199 {offsets = [0, 0], sizes = [1, 256], strides = [1, 1]} : vector<4x256xf32> to vector<1x256xf32>
    %202 = vector.broadcast %200 : vector<4x1xf32> to vector<4x256xf32>
    %203 = vector.broadcast %201 : vector<1x256xf32> to vector<4x256xf32>
    %204 = arith.mulf %202, %203 : vector<4x256xf32>
    %205 = arith.addf %190, %204 : vector<4x256xf32>
    %206 = vector.extract_strided_slice %3 {offsets = [0, 25], sizes = [4, 1], strides = [1, 1]} : vector<4x36xf32> to vector<4x1xf32>
    %207 = vector.extract_strided_slice %199 {offsets = [1, 0], sizes = [1, 256], strides = [1, 1]} : vector<4x256xf32> to vector<1x256xf32>
    %208 = vector.broadcast %206 : vector<4x1xf32> to vector<4x256xf32>
    %209 = vector.broadcast %207 : vector<1x256xf32> to vector<4x256xf32>
    %210 = arith.mulf %208, %209 : vector<4x256xf32>
    %211 = arith.addf %205, %210 : vector<4x256xf32>
    %212 = vector.extract_strided_slice %3 {offsets = [0, 26], sizes = [4, 1], strides = [1, 1]} : vector<4x36xf32> to vector<4x1xf32>
    %213 = vector.extract_strided_slice %199 {offsets = [2, 0], sizes = [1, 256], strides = [1, 1]} : vector<4x256xf32> to vector<1x256xf32>
    %214 = vector.broadcast %212 : vector<4x1xf32> to vector<4x256xf32>
    %215 = vector.broadcast %213 : vector<1x256xf32> to vector<4x256xf32>
    %216 = arith.mulf %214, %215 : vector<4x256xf32>
    %217 = arith.addf %211, %216 : vector<4x256xf32>
    %218 = vector.extract_strided_slice %3 {offsets = [0, 27], sizes = [4, 1], strides = [1, 1]} : vector<4x36xf32> to vector<4x1xf32>
    %219 = vector.extract_strided_slice %199 {offsets = [3, 0], sizes = [1, 256], strides = [1, 1]} : vector<4x256xf32> to vector<1x256xf32>
    %220 = vector.broadcast %218 : vector<4x1xf32> to vector<4x256xf32>
    %221 = vector.broadcast %219 : vector<1x256xf32> to vector<4x256xf32>
    %222 = arith.mulf %220, %221 : vector<4x256xf32>
    %223 = arith.addf %217, %222 : vector<4x256xf32>
    %cst_26 = arith.constant 0.000000e+00 : f32
    %224 = vector.broadcast %cst_26 : f32 to vector<4x16xf32>
    %225 = vector.extract_strided_slice %1 {offsets = [0, 16], sizes = [4, 240], strides = [1, 1]} : vector<4x256xf32> to vector<4x240xf32>
    %226 = tpu.concatenate %225, %224 in 1 : vector<4x240xf32>, vector<4x16xf32> -> vector<4x256xf32>
    %227 = vector.extract_strided_slice %3 {offsets = [0, 28], sizes = [4, 1], strides = [1, 1]} : vector<4x36xf32> to vector<4x1xf32>
    %228 = vector.extract_strided_slice %226 {offsets = [0, 0], sizes = [1, 256], strides = [1, 1]} : vector<4x256xf32> to vector<1x256xf32>
    %229 = vector.broadcast %227 : vector<4x1xf32> to vector<4x256xf32>
    %230 = vector.broadcast %228 : vector<1x256xf32> to vector<4x256xf32>
    %231 = arith.mulf %229, %230 : vector<4x256xf32>
    %232 = arith.addf %223, %231 : vector<4x256xf32>
    %233 = vector.extract_strided_slice %3 {offsets = [0, 29], sizes = [4, 1], strides = [1, 1]} : vector<4x36xf32> to vector<4x1xf32>
    %234 = vector.extract_strided_slice %226 {offsets = [1, 0], sizes = [1, 256], strides = [1, 1]} : vector<4x256xf32> to vector<1x256xf32>
    %235 = vector.broadcast %233 : vector<4x1xf32> to vector<4x256xf32>
    %236 = vector.broadcast %234 : vector<1x256xf32> to vector<4x256xf32>
    %237 = arith.mulf %235, %236 : vector<4x256xf32>
    %238 = arith.addf %232, %237 : vector<4x256xf32>
    %239 = vector.extract_strided_slice %3 {offsets = [0, 30], sizes = [4, 1], strides = [1, 1]} : vector<4x36xf32> to vector<4x1xf32>
    %240 = vector.extract_strided_slice %226 {offsets = [2, 0], sizes = [1, 256], strides = [1, 1]} : vector<4x256xf32> to vector<1x256xf32>
    %241 = vector.broadcast %239 : vector<4x1xf32> to vector<4x256xf32>
    %242 = vector.broadcast %240 : vector<1x256xf32> to vector<4x256xf32>
    %243 = arith.mulf %241, %242 : vector<4x256xf32>
    %244 = arith.addf %238, %243 : vector<4x256xf32>
    %245 = vector.extract_strided_slice %3 {offsets = [0, 31], sizes = [4, 1], strides = [1, 1]} : vector<4x36xf32> to vector<4x1xf32>
    %246 = vector.extract_strided_slice %226 {offsets = [3, 0], sizes = [1, 256], strides = [1, 1]} : vector<4x256xf32> to vector<1x256xf32>
    %247 = vector.broadcast %245 : vector<4x1xf32> to vector<4x256xf32>
    %248 = vector.broadcast %246 : vector<1x256xf32> to vector<4x256xf32>
    %249 = arith.mulf %247, %248 : vector<4x256xf32>
    %250 = arith.addf %244, %249 : vector<4x256xf32>
    %cst_27 = arith.constant 0.000000e+00 : f32
    %251 = vector.broadcast %cst_27 : f32 to vector<4x17xf32>
    %252 = vector.extract_strided_slice %1 {offsets = [0, 17], sizes = [4, 239], strides = [1, 1]} : vector<4x256xf32> to vector<4x239xf32>
    %253 = tpu.concatenate %252, %251 in 1 : vector<4x239xf32>, vector<4x17xf32> -> vector<4x256xf32>
    %c15_i32_28 = arith.constant 15 : i32
    %254 = vector.broadcast %c15_i32_28 : i32 to vector<1x256xi32>
    %255 = arith.cmpi slt, %2, %254 : vector<1x256xi32>
    %cst_29 = arith.constant 0.000000e+00 : f32
    %256 = vector.shape_cast %255 : vector<1x256xi1> to vector<1x256xi1>
    %257 = vector.broadcast %256 : vector<1x256xi1> to vector<4x256xi1>
    %258 = vector.broadcast %cst_29 : f32 to vector<4x256xf32>
    %259 = arith.select %257, %253, %258 : vector<4x256xi1>, vector<4x256xf32>
    %260 = vector.extract_strided_slice %3 {offsets = [0, 32], sizes = [4, 1], strides = [1, 1]} : vector<4x36xf32> to vector<4x1xf32>
    %261 = vector.extract_strided_slice %259 {offsets = [0, 0], sizes = [1, 256], strides = [1, 1]} : vector<4x256xf32> to vector<1x256xf32>
    %262 = vector.broadcast %260 : vector<4x1xf32> to vector<4x256xf32>
    %263 = vector.broadcast %261 : vector<1x256xf32> to vector<4x256xf32>
    %264 = arith.mulf %262, %263 : vector<4x256xf32>
    %265 = arith.addf %250, %264 : vector<4x256xf32>
    %266 = vector.extract_strided_slice %3 {offsets = [0, 33], sizes = [4, 1], strides = [1, 1]} : vector<4x36xf32> to vector<4x1xf32>
    %267 = vector.extract_strided_slice %259 {offsets = [1, 0], sizes = [1, 256], strides = [1, 1]} : vector<4x256xf32> to vector<1x256xf32>
    %268 = vector.broadcast %266 : vector<4x1xf32> to vector<4x256xf32>
    %269 = vector.broadcast %267 : vector<1x256xf32> to vector<4x256xf32>
    %270 = arith.mulf %268, %269 : vector<4x256xf32>
    %271 = arith.addf %265, %270 : vector<4x256xf32>
    %272 = vector.extract_strided_slice %3 {offsets = [0, 34], sizes = [4, 1], strides = [1, 1]} : vector<4x36xf32> to vector<4x1xf32>
    %273 = vector.extract_strided_slice %259 {offsets = [2, 0], sizes = [1, 256], strides = [1, 1]} : vector<4x256xf32> to vector<1x256xf32>
    %274 = vector.broadcast %272 : vector<4x1xf32> to vector<4x256xf32>
    %275 = vector.broadcast %273 : vector<1x256xf32> to vector<4x256xf32>
    %276 = arith.mulf %274, %275 : vector<4x256xf32>
    %277 = arith.addf %271, %276 : vector<4x256xf32>
    %278 = vector.extract_strided_slice %3 {offsets = [0, 35], sizes = [4, 1], strides = [1, 1]} : vector<4x36xf32> to vector<4x1xf32>
    %279 = vector.extract_strided_slice %259 {offsets = [3, 0], sizes = [1, 256], strides = [1, 1]} : vector<4x256xf32> to vector<1x256xf32>
    %280 = vector.broadcast %278 : vector<4x1xf32> to vector<4x256xf32>
    %281 = vector.broadcast %279 : vector<1x256xf32> to vector<4x256xf32>
    %282 = arith.mulf %280, %281 : vector<4x256xf32>
    %283 = arith.addf %277, %282 : vector<4x256xf32>
    %284 = vector.broadcast %5 : vector<4x1xf32> to vector<4x256xf32>
    %285 = arith.addf %283, %284 : vector<4x256xf32>
    %cst_30 = arith.constant 0.000000e+00 : f32
    %286 = vector.broadcast %cst_30 : f32 to vector<4x256xf32>
    %287 = arith.maximumf %285, %286 : vector<4x256xf32>
    %cst_31 = arith.constant 0.000000e+00 : f32
    %288 = vector.broadcast %cst_31 : f32 to vector<4x256xf32>
    %cst_32 = arith.constant 0.000000e+00 : f32
    %289 = vector.broadcast %cst_32 : f32 to vector<4x17xf32>
    %290 = vector.extract_strided_slice %287 {offsets = [0, 0], sizes = [4, 239], strides = [1, 1]} : vector<4x256xf32> to vector<4x239xf32>
    %291 = tpu.concatenate %289, %290 in 1 : vector<4x17xf32>, vector<4x239xf32> -> vector<4x256xf32>
    %c1_i32_33 = arith.constant 1 : i32
    %292 = vector.broadcast %c1_i32_33 : i32 to vector<1x256xi32>
    %293 = arith.cmpi sge, %2, %292 : vector<1x256xi32>
    %cst_34 = arith.constant 0.000000e+00 : f32
    %294 = vector.shape_cast %293 : vector<1x256xi1> to vector<1x256xi1>
    %295 = vector.broadcast %294 : vector<1x256xi1> to vector<4x256xi1>
    %296 = vector.broadcast %cst_34 : f32 to vector<4x256xf32>
    %297 = arith.select %295, %291, %296 : vector<4x256xi1>, vector<4x256xf32>
    %298 = vector.extract_strided_slice %4 {offsets = [0, 0], sizes = [4, 1], strides = [1, 1]} : vector<4x36xf32> to vector<4x1xf32>
    %299 = vector.extract_strided_slice %297 {offsets = [0, 0], sizes = [1, 256], strides = [1, 1]} : vector<4x256xf32> to vector<1x256xf32>
    %300 = vector.broadcast %298 : vector<4x1xf32> to vector<4x256xf32>
    %301 = vector.broadcast %299 : vector<1x256xf32> to vector<4x256xf32>
    %302 = arith.mulf %300, %301 : vector<4x256xf32>
    %303 = arith.addf %288, %302 : vector<4x256xf32>
    %304 = vector.extract_strided_slice %4 {offsets = [0, 1], sizes = [4, 1], strides = [1, 1]} : vector<4x36xf32> to vector<4x1xf32>
    %305 = vector.extract_strided_slice %297 {offsets = [1, 0], sizes = [1, 256], strides = [1, 1]} : vector<4x256xf32> to vector<1x256xf32>
    %306 = vector.broadcast %304 : vector<4x1xf32> to vector<4x256xf32>
    %307 = vector.broadcast %305 : vector<1x256xf32> to vector<4x256xf32>
    %308 = arith.mulf %306, %307 : vector<4x256xf32>
    %309 = arith.addf %303, %308 : vector<4x256xf32>
    %310 = vector.extract_strided_slice %4 {offsets = [0, 2], sizes = [4, 1], strides = [1, 1]} : vector<4x36xf32> to vector<4x1xf32>
    %311 = vector.extract_strided_slice %297 {offsets = [2, 0], sizes = [1, 256], strides = [1, 1]} : vector<4x256xf32> to vector<1x256xf32>
    %312 = vector.broadcast %310 : vector<4x1xf32> to vector<4x256xf32>
    %313 = vector.broadcast %311 : vector<1x256xf32> to vector<4x256xf32>
    %314 = arith.mulf %312, %313 : vector<4x256xf32>
    %315 = arith.addf %309, %314 : vector<4x256xf32>
    %316 = vector.extract_strided_slice %4 {offsets = [0, 3], sizes = [4, 1], strides = [1, 1]} : vector<4x36xf32> to vector<4x1xf32>
    %317 = vector.extract_strided_slice %297 {offsets = [3, 0], sizes = [1, 256], strides = [1, 1]} : vector<4x256xf32> to vector<1x256xf32>
    %318 = vector.broadcast %316 : vector<4x1xf32> to vector<4x256xf32>
    %319 = vector.broadcast %317 : vector<1x256xf32> to vector<4x256xf32>
    %320 = arith.mulf %318, %319 : vector<4x256xf32>
    %321 = arith.addf %315, %320 : vector<4x256xf32>
    %cst_35 = arith.constant 0.000000e+00 : f32
    %322 = vector.broadcast %cst_35 : f32 to vector<4x16xf32>
    %323 = vector.extract_strided_slice %287 {offsets = [0, 0], sizes = [4, 240], strides = [1, 1]} : vector<4x256xf32> to vector<4x240xf32>
    %324 = tpu.concatenate %322, %323 in 1 : vector<4x16xf32>, vector<4x240xf32> -> vector<4x256xf32>
    %325 = vector.extract_strided_slice %4 {offsets = [0, 4], sizes = [4, 1], strides = [1, 1]} : vector<4x36xf32> to vector<4x1xf32>
    %326 = vector.extract_strided_slice %324 {offsets = [0, 0], sizes = [1, 256], strides = [1, 1]} : vector<4x256xf32> to vector<1x256xf32>
    %327 = vector.broadcast %325 : vector<4x1xf32> to vector<4x256xf32>
    %328 = vector.broadcast %326 : vector<1x256xf32> to vector<4x256xf32>
    %329 = arith.mulf %327, %328 : vector<4x256xf32>
    %330 = arith.addf %321, %329 : vector<4x256xf32>
    %331 = vector.extract_strided_slice %4 {offsets = [0, 5], sizes = [4, 1], strides = [1, 1]} : vector<4x36xf32> to vector<4x1xf32>
    %332 = vector.extract_strided_slice %324 {offsets = [1, 0], sizes = [1, 256], strides = [1, 1]} : vector<4x256xf32> to vector<1x256xf32>
    %333 = vector.broadcast %331 : vector<4x1xf32> to vector<4x256xf32>
    %334 = vector.broadcast %332 : vector<1x256xf32> to vector<4x256xf32>
    %335 = arith.mulf %333, %334 : vector<4x256xf32>
    %336 = arith.addf %330, %335 : vector<4x256xf32>
    %337 = vector.extract_strided_slice %4 {offsets = [0, 6], sizes = [4, 1], strides = [1, 1]} : vector<4x36xf32> to vector<4x1xf32>
    %338 = vector.extract_strided_slice %324 {offsets = [2, 0], sizes = [1, 256], strides = [1, 1]} : vector<4x256xf32> to vector<1x256xf32>
    %339 = vector.broadcast %337 : vector<4x1xf32> to vector<4x256xf32>
    %340 = vector.broadcast %338 : vector<1x256xf32> to vector<4x256xf32>
    %341 = arith.mulf %339, %340 : vector<4x256xf32>
    %342 = arith.addf %336, %341 : vector<4x256xf32>
    %343 = vector.extract_strided_slice %4 {offsets = [0, 7], sizes = [4, 1], strides = [1, 1]} : vector<4x36xf32> to vector<4x1xf32>
    %344 = vector.extract_strided_slice %324 {offsets = [3, 0], sizes = [1, 256], strides = [1, 1]} : vector<4x256xf32> to vector<1x256xf32>
    %345 = vector.broadcast %343 : vector<4x1xf32> to vector<4x256xf32>
    %346 = vector.broadcast %344 : vector<1x256xf32> to vector<4x256xf32>
    %347 = arith.mulf %345, %346 : vector<4x256xf32>
    %348 = arith.addf %342, %347 : vector<4x256xf32>
    %cst_36 = arith.constant 0.000000e+00 : f32
    %349 = vector.broadcast %cst_36 : f32 to vector<4x15xf32>
    %350 = vector.extract_strided_slice %287 {offsets = [0, 0], sizes = [4, 241], strides = [1, 1]} : vector<4x256xf32> to vector<4x241xf32>
    %351 = tpu.concatenate %349, %350 in 1 : vector<4x15xf32>, vector<4x241xf32> -> vector<4x256xf32>
    %c15_i32_37 = arith.constant 15 : i32
    %352 = vector.broadcast %c15_i32_37 : i32 to vector<1x256xi32>
    %353 = arith.cmpi slt, %2, %352 : vector<1x256xi32>
    %cst_38 = arith.constant 0.000000e+00 : f32
    %354 = vector.shape_cast %353 : vector<1x256xi1> to vector<1x256xi1>
    %355 = vector.broadcast %354 : vector<1x256xi1> to vector<4x256xi1>
    %356 = vector.broadcast %cst_38 : f32 to vector<4x256xf32>
    %357 = arith.select %355, %351, %356 : vector<4x256xi1>, vector<4x256xf32>
    %358 = vector.extract_strided_slice %4 {offsets = [0, 8], sizes = [4, 1], strides = [1, 1]} : vector<4x36xf32> to vector<4x1xf32>
    %359 = vector.extract_strided_slice %357 {offsets = [0, 0], sizes = [1, 256], strides = [1, 1]} : vector<4x256xf32> to vector<1x256xf32>
    %360 = vector.broadcast %358 : vector<4x1xf32> to vector<4x256xf32>
    %361 = vector.broadcast %359 : vector<1x256xf32> to vector<4x256xf32>
    %362 = arith.mulf %360, %361 : vector<4x256xf32>
    %363 = arith.addf %348, %362 : vector<4x256xf32>
    %364 = vector.extract_strided_slice %4 {offsets = [0, 9], sizes = [4, 1], strides = [1, 1]} : vector<4x36xf32> to vector<4x1xf32>
    %365 = vector.extract_strided_slice %357 {offsets = [1, 0], sizes = [1, 256], strides = [1, 1]} : vector<4x256xf32> to vector<1x256xf32>
    %366 = vector.broadcast %364 : vector<4x1xf32> to vector<4x256xf32>
    %367 = vector.broadcast %365 : vector<1x256xf32> to vector<4x256xf32>
    %368 = arith.mulf %366, %367 : vector<4x256xf32>
    %369 = arith.addf %363, %368 : vector<4x256xf32>
    %370 = vector.extract_strided_slice %4 {offsets = [0, 10], sizes = [4, 1], strides = [1, 1]} : vector<4x36xf32> to vector<4x1xf32>
    %371 = vector.extract_strided_slice %357 {offsets = [2, 0], sizes = [1, 256], strides = [1, 1]} : vector<4x256xf32> to vector<1x256xf32>
    %372 = vector.broadcast %370 : vector<4x1xf32> to vector<4x256xf32>
    %373 = vector.broadcast %371 : vector<1x256xf32> to vector<4x256xf32>
    %374 = arith.mulf %372, %373 : vector<4x256xf32>
    %375 = arith.addf %369, %374 : vector<4x256xf32>
    %376 = vector.extract_strided_slice %4 {offsets = [0, 11], sizes = [4, 1], strides = [1, 1]} : vector<4x36xf32> to vector<4x1xf32>
    %377 = vector.extract_strided_slice %357 {offsets = [3, 0], sizes = [1, 256], strides = [1, 1]} : vector<4x256xf32> to vector<1x256xf32>
    %378 = vector.broadcast %376 : vector<4x1xf32> to vector<4x256xf32>
    %379 = vector.broadcast %377 : vector<1x256xf32> to vector<4x256xf32>
    %380 = arith.mulf %378, %379 : vector<4x256xf32>
    %381 = arith.addf %375, %380 : vector<4x256xf32>
    %cst_39 = arith.constant 0.000000e+00 : f32
    %382 = vector.broadcast %cst_39 : f32 to vector<4x1xf32>
    %383 = vector.extract_strided_slice %287 {offsets = [0, 0], sizes = [4, 255], strides = [1, 1]} : vector<4x256xf32> to vector<4x255xf32>
    %384 = tpu.concatenate %382, %383 in 1 : vector<4x1xf32>, vector<4x255xf32> -> vector<4x256xf32>
    %c1_i32_40 = arith.constant 1 : i32
    %385 = vector.broadcast %c1_i32_40 : i32 to vector<1x256xi32>
    %386 = arith.cmpi sge, %2, %385 : vector<1x256xi32>
    %cst_41 = arith.constant 0.000000e+00 : f32
    %387 = vector.shape_cast %386 : vector<1x256xi1> to vector<1x256xi1>
    %388 = vector.broadcast %387 : vector<1x256xi1> to vector<4x256xi1>
    %389 = vector.broadcast %cst_41 : f32 to vector<4x256xf32>
    %390 = arith.select %388, %384, %389 : vector<4x256xi1>, vector<4x256xf32>
    %391 = vector.extract_strided_slice %4 {offsets = [0, 12], sizes = [4, 1], strides = [1, 1]} : vector<4x36xf32> to vector<4x1xf32>
    %392 = vector.extract_strided_slice %390 {offsets = [0, 0], sizes = [1, 256], strides = [1, 1]} : vector<4x256xf32> to vector<1x256xf32>
    %393 = vector.broadcast %391 : vector<4x1xf32> to vector<4x256xf32>
    %394 = vector.broadcast %392 : vector<1x256xf32> to vector<4x256xf32>
    %395 = arith.mulf %393, %394 : vector<4x256xf32>
    %396 = arith.addf %381, %395 : vector<4x256xf32>
    %397 = vector.extract_strided_slice %4 {offsets = [0, 13], sizes = [4, 1], strides = [1, 1]} : vector<4x36xf32> to vector<4x1xf32>
    %398 = vector.extract_strided_slice %390 {offsets = [1, 0], sizes = [1, 256], strides = [1, 1]} : vector<4x256xf32> to vector<1x256xf32>
    %399 = vector.broadcast %397 : vector<4x1xf32> to vector<4x256xf32>
    %400 = vector.broadcast %398 : vector<1x256xf32> to vector<4x256xf32>
    %401 = arith.mulf %399, %400 : vector<4x256xf32>
    %402 = arith.addf %396, %401 : vector<4x256xf32>
    %403 = vector.extract_strided_slice %4 {offsets = [0, 14], sizes = [4, 1], strides = [1, 1]} : vector<4x36xf32> to vector<4x1xf32>
    %404 = vector.extract_strided_slice %390 {offsets = [2, 0], sizes = [1, 256], strides = [1, 1]} : vector<4x256xf32> to vector<1x256xf32>
    %405 = vector.broadcast %403 : vector<4x1xf32> to vector<4x256xf32>
    %406 = vector.broadcast %404 : vector<1x256xf32> to vector<4x256xf32>
    %407 = arith.mulf %405, %406 : vector<4x256xf32>
    %408 = arith.addf %402, %407 : vector<4x256xf32>
    %409 = vector.extract_strided_slice %4 {offsets = [0, 15], sizes = [4, 1], strides = [1, 1]} : vector<4x36xf32> to vector<4x1xf32>
    %410 = vector.extract_strided_slice %390 {offsets = [3, 0], sizes = [1, 256], strides = [1, 1]} : vector<4x256xf32> to vector<1x256xf32>
    %411 = vector.broadcast %409 : vector<4x1xf32> to vector<4x256xf32>
    %412 = vector.broadcast %410 : vector<1x256xf32> to vector<4x256xf32>
    %413 = arith.mulf %411, %412 : vector<4x256xf32>
    %414 = arith.addf %408, %413 : vector<4x256xf32>
    %415 = vector.extract_strided_slice %4 {offsets = [0, 16], sizes = [4, 1], strides = [1, 1]} : vector<4x36xf32> to vector<4x1xf32>
    %416 = vector.extract_strided_slice %287 {offsets = [0, 0], sizes = [1, 256], strides = [1, 1]} : vector<4x256xf32> to vector<1x256xf32>
    %417 = vector.broadcast %415 : vector<4x1xf32> to vector<4x256xf32>
    %418 = vector.broadcast %416 : vector<1x256xf32> to vector<4x256xf32>
    %419 = arith.mulf %417, %418 : vector<4x256xf32>
    %420 = arith.addf %414, %419 : vector<4x256xf32>
    %421 = vector.extract_strided_slice %4 {offsets = [0, 17], sizes = [4, 1], strides = [1, 1]} : vector<4x36xf32> to vector<4x1xf32>
    %422 = vector.extract_strided_slice %287 {offsets = [1, 0], sizes = [1, 256], strides = [1, 1]} : vector<4x256xf32> to vector<1x256xf32>
    %423 = vector.broadcast %421 : vector<4x1xf32> to vector<4x256xf32>
    %424 = vector.broadcast %422 : vector<1x256xf32> to vector<4x256xf32>
    %425 = arith.mulf %423, %424 : vector<4x256xf32>
    %426 = arith.addf %420, %425 : vector<4x256xf32>
    %427 = vector.extract_strided_slice %4 {offsets = [0, 18], sizes = [4, 1], strides = [1, 1]} : vector<4x36xf32> to vector<4x1xf32>
    %428 = vector.extract_strided_slice %287 {offsets = [2, 0], sizes = [1, 256], strides = [1, 1]} : vector<4x256xf32> to vector<1x256xf32>
    %429 = vector.broadcast %427 : vector<4x1xf32> to vector<4x256xf32>
    %430 = vector.broadcast %428 : vector<1x256xf32> to vector<4x256xf32>
    %431 = arith.mulf %429, %430 : vector<4x256xf32>
    %432 = arith.addf %426, %431 : vector<4x256xf32>
    %433 = vector.extract_strided_slice %4 {offsets = [0, 19], sizes = [4, 1], strides = [1, 1]} : vector<4x36xf32> to vector<4x1xf32>
    %434 = vector.extract_strided_slice %287 {offsets = [3, 0], sizes = [1, 256], strides = [1, 1]} : vector<4x256xf32> to vector<1x256xf32>
    %435 = vector.broadcast %433 : vector<4x1xf32> to vector<4x256xf32>
    %436 = vector.broadcast %434 : vector<1x256xf32> to vector<4x256xf32>
    %437 = arith.mulf %435, %436 : vector<4x256xf32>
    %438 = arith.addf %432, %437 : vector<4x256xf32>
    %cst_42 = arith.constant 0.000000e+00 : f32
    %439 = vector.broadcast %cst_42 : f32 to vector<4x1xf32>
    %440 = vector.extract_strided_slice %287 {offsets = [0, 1], sizes = [4, 255], strides = [1, 1]} : vector<4x256xf32> to vector<4x255xf32>
    %441 = tpu.concatenate %440, %439 in 1 : vector<4x255xf32>, vector<4x1xf32> -> vector<4x256xf32>
    %c15_i32_43 = arith.constant 15 : i32
    %442 = vector.broadcast %c15_i32_43 : i32 to vector<1x256xi32>
    %443 = arith.cmpi slt, %2, %442 : vector<1x256xi32>
    %cst_44 = arith.constant 0.000000e+00 : f32
    %444 = vector.shape_cast %443 : vector<1x256xi1> to vector<1x256xi1>
    %445 = vector.broadcast %444 : vector<1x256xi1> to vector<4x256xi1>
    %446 = vector.broadcast %cst_44 : f32 to vector<4x256xf32>
    %447 = arith.select %445, %441, %446 : vector<4x256xi1>, vector<4x256xf32>
    %448 = vector.extract_strided_slice %4 {offsets = [0, 20], sizes = [4, 1], strides = [1, 1]} : vector<4x36xf32> to vector<4x1xf32>
    %449 = vector.extract_strided_slice %447 {offsets = [0, 0], sizes = [1, 256], strides = [1, 1]} : vector<4x256xf32> to vector<1x256xf32>
    %450 = vector.broadcast %448 : vector<4x1xf32> to vector<4x256xf32>
    %451 = vector.broadcast %449 : vector<1x256xf32> to vector<4x256xf32>
    %452 = arith.mulf %450, %451 : vector<4x256xf32>
    %453 = arith.addf %438, %452 : vector<4x256xf32>
    %454 = vector.extract_strided_slice %4 {offsets = [0, 21], sizes = [4, 1], strides = [1, 1]} : vector<4x36xf32> to vector<4x1xf32>
    %455 = vector.extract_strided_slice %447 {offsets = [1, 0], sizes = [1, 256], strides = [1, 1]} : vector<4x256xf32> to vector<1x256xf32>
    %456 = vector.broadcast %454 : vector<4x1xf32> to vector<4x256xf32>
    %457 = vector.broadcast %455 : vector<1x256xf32> to vector<4x256xf32>
    %458 = arith.mulf %456, %457 : vector<4x256xf32>
    %459 = arith.addf %453, %458 : vector<4x256xf32>
    %460 = vector.extract_strided_slice %4 {offsets = [0, 22], sizes = [4, 1], strides = [1, 1]} : vector<4x36xf32> to vector<4x1xf32>
    %461 = vector.extract_strided_slice %447 {offsets = [2, 0], sizes = [1, 256], strides = [1, 1]} : vector<4x256xf32> to vector<1x256xf32>
    %462 = vector.broadcast %460 : vector<4x1xf32> to vector<4x256xf32>
    %463 = vector.broadcast %461 : vector<1x256xf32> to vector<4x256xf32>
    %464 = arith.mulf %462, %463 : vector<4x256xf32>
    %465 = arith.addf %459, %464 : vector<4x256xf32>
    %466 = vector.extract_strided_slice %4 {offsets = [0, 23], sizes = [4, 1], strides = [1, 1]} : vector<4x36xf32> to vector<4x1xf32>
    %467 = vector.extract_strided_slice %447 {offsets = [3, 0], sizes = [1, 256], strides = [1, 1]} : vector<4x256xf32> to vector<1x256xf32>
    %468 = vector.broadcast %466 : vector<4x1xf32> to vector<4x256xf32>
    %469 = vector.broadcast %467 : vector<1x256xf32> to vector<4x256xf32>
    %470 = arith.mulf %468, %469 : vector<4x256xf32>
    %471 = arith.addf %465, %470 : vector<4x256xf32>
    %cst_45 = arith.constant 0.000000e+00 : f32
    %472 = vector.broadcast %cst_45 : f32 to vector<4x15xf32>
    %473 = vector.extract_strided_slice %287 {offsets = [0, 15], sizes = [4, 241], strides = [1, 1]} : vector<4x256xf32> to vector<4x241xf32>
    %474 = tpu.concatenate %473, %472 in 1 : vector<4x241xf32>, vector<4x15xf32> -> vector<4x256xf32>
    %c1_i32_46 = arith.constant 1 : i32
    %475 = vector.broadcast %c1_i32_46 : i32 to vector<1x256xi32>
    %476 = arith.cmpi sge, %2, %475 : vector<1x256xi32>
    %cst_47 = arith.constant 0.000000e+00 : f32
    %477 = vector.shape_cast %476 : vector<1x256xi1> to vector<1x256xi1>
    %478 = vector.broadcast %477 : vector<1x256xi1> to vector<4x256xi1>
    %479 = vector.broadcast %cst_47 : f32 to vector<4x256xf32>
    %480 = arith.select %478, %474, %479 : vector<4x256xi1>, vector<4x256xf32>
    %481 = vector.extract_strided_slice %4 {offsets = [0, 24], sizes = [4, 1], strides = [1, 1]} : vector<4x36xf32> to vector<4x1xf32>
    %482 = vector.extract_strided_slice %480 {offsets = [0, 0], sizes = [1, 256], strides = [1, 1]} : vector<4x256xf32> to vector<1x256xf32>
    %483 = vector.broadcast %481 : vector<4x1xf32> to vector<4x256xf32>
    %484 = vector.broadcast %482 : vector<1x256xf32> to vector<4x256xf32>
    %485 = arith.mulf %483, %484 : vector<4x256xf32>
    %486 = arith.addf %471, %485 : vector<4x256xf32>
    %487 = vector.extract_strided_slice %4 {offsets = [0, 25], sizes = [4, 1], strides = [1, 1]} : vector<4x36xf32> to vector<4x1xf32>
    %488 = vector.extract_strided_slice %480 {offsets = [1, 0], sizes = [1, 256], strides = [1, 1]} : vector<4x256xf32> to vector<1x256xf32>
    %489 = vector.broadcast %487 : vector<4x1xf32> to vector<4x256xf32>
    %490 = vector.broadcast %488 : vector<1x256xf32> to vector<4x256xf32>
    %491 = arith.mulf %489, %490 : vector<4x256xf32>
    %492 = arith.addf %486, %491 : vector<4x256xf32>
    %493 = vector.extract_strided_slice %4 {offsets = [0, 26], sizes = [4, 1], strides = [1, 1]} : vector<4x36xf32> to vector<4x1xf32>
    %494 = vector.extract_strided_slice %480 {offsets = [2, 0], sizes = [1, 256], strides = [1, 1]} : vector<4x256xf32> to vector<1x256xf32>
    %495 = vector.broadcast %493 : vector<4x1xf32> to vector<4x256xf32>
    %496 = vector.broadcast %494 : vector<1x256xf32> to vector<4x256xf32>
    %497 = arith.mulf %495, %496 : vector<4x256xf32>
    %498 = arith.addf %492, %497 : vector<4x256xf32>
    %499 = vector.extract_strided_slice %4 {offsets = [0, 27], sizes = [4, 1], strides = [1, 1]} : vector<4x36xf32> to vector<4x1xf32>
    %500 = vector.extract_strided_slice %480 {offsets = [3, 0], sizes = [1, 256], strides = [1, 1]} : vector<4x256xf32> to vector<1x256xf32>
    %501 = vector.broadcast %499 : vector<4x1xf32> to vector<4x256xf32>
    %502 = vector.broadcast %500 : vector<1x256xf32> to vector<4x256xf32>
    %503 = arith.mulf %501, %502 : vector<4x256xf32>
    %504 = arith.addf %498, %503 : vector<4x256xf32>
    %cst_48 = arith.constant 0.000000e+00 : f32
    %505 = vector.broadcast %cst_48 : f32 to vector<4x16xf32>
    %506 = vector.extract_strided_slice %287 {offsets = [0, 16], sizes = [4, 240], strides = [1, 1]} : vector<4x256xf32> to vector<4x240xf32>
    %507 = tpu.concatenate %506, %505 in 1 : vector<4x240xf32>, vector<4x16xf32> -> vector<4x256xf32>
    %508 = vector.extract_strided_slice %4 {offsets = [0, 28], sizes = [4, 1], strides = [1, 1]} : vector<4x36xf32> to vector<4x1xf32>
    %509 = vector.extract_strided_slice %507 {offsets = [0, 0], sizes = [1, 256], strides = [1, 1]} : vector<4x256xf32> to vector<1x256xf32>
    %510 = vector.broadcast %508 : vector<4x1xf32> to vector<4x256xf32>
    %511 = vector.broadcast %509 : vector<1x256xf32> to vector<4x256xf32>
    %512 = arith.mulf %510, %511 : vector<4x256xf32>
    %513 = arith.addf %504, %512 : vector<4x256xf32>
    %514 = vector.extract_strided_slice %4 {offsets = [0, 29], sizes = [4, 1], strides = [1, 1]} : vector<4x36xf32> to vector<4x1xf32>
    %515 = vector.extract_strided_slice %507 {offsets = [1, 0], sizes = [1, 256], strides = [1, 1]} : vector<4x256xf32> to vector<1x256xf32>
    %516 = vector.broadcast %514 : vector<4x1xf32> to vector<4x256xf32>
    %517 = vector.broadcast %515 : vector<1x256xf32> to vector<4x256xf32>
    %518 = arith.mulf %516, %517 : vector<4x256xf32>
    %519 = arith.addf %513, %518 : vector<4x256xf32>
    %520 = vector.extract_strided_slice %4 {offsets = [0, 30], sizes = [4, 1], strides = [1, 1]} : vector<4x36xf32> to vector<4x1xf32>
    %521 = vector.extract_strided_slice %507 {offsets = [2, 0], sizes = [1, 256], strides = [1, 1]} : vector<4x256xf32> to vector<1x256xf32>
    %522 = vector.broadcast %520 : vector<4x1xf32> to vector<4x256xf32>
    %523 = vector.broadcast %521 : vector<1x256xf32> to vector<4x256xf32>
    %524 = arith.mulf %522, %523 : vector<4x256xf32>
    %525 = arith.addf %519, %524 : vector<4x256xf32>
    %526 = vector.extract_strided_slice %4 {offsets = [0, 31], sizes = [4, 1], strides = [1, 1]} : vector<4x36xf32> to vector<4x1xf32>
    %527 = vector.extract_strided_slice %507 {offsets = [3, 0], sizes = [1, 256], strides = [1, 1]} : vector<4x256xf32> to vector<1x256xf32>
    %528 = vector.broadcast %526 : vector<4x1xf32> to vector<4x256xf32>
    %529 = vector.broadcast %527 : vector<1x256xf32> to vector<4x256xf32>
    %530 = arith.mulf %528, %529 : vector<4x256xf32>
    %531 = arith.addf %525, %530 : vector<4x256xf32>
    %cst_49 = arith.constant 0.000000e+00 : f32
    %532 = vector.broadcast %cst_49 : f32 to vector<4x17xf32>
    %533 = vector.extract_strided_slice %287 {offsets = [0, 17], sizes = [4, 239], strides = [1, 1]} : vector<4x256xf32> to vector<4x239xf32>
    %534 = tpu.concatenate %533, %532 in 1 : vector<4x239xf32>, vector<4x17xf32> -> vector<4x256xf32>
    %c15_i32_50 = arith.constant 15 : i32
    %535 = vector.broadcast %c15_i32_50 : i32 to vector<1x256xi32>
    %536 = arith.cmpi slt, %2, %535 : vector<1x256xi32>
    %cst_51 = arith.constant 0.000000e+00 : f32
    %537 = vector.shape_cast %536 : vector<1x256xi1> to vector<1x256xi1>
    %538 = vector.broadcast %537 : vector<1x256xi1> to vector<4x256xi1>
    %539 = vector.broadcast %cst_51 : f32 to vector<4x256xf32>
    %540 = arith.select %538, %534, %539 : vector<4x256xi1>, vector<4x256xf32>
    %541 = vector.extract_strided_slice %4 {offsets = [0, 32], sizes = [4, 1], strides = [1, 1]} : vector<4x36xf32> to vector<4x1xf32>
    %542 = vector.extract_strided_slice %540 {offsets = [0, 0], sizes = [1, 256], strides = [1, 1]} : vector<4x256xf32> to vector<1x256xf32>
    %543 = vector.broadcast %541 : vector<4x1xf32> to vector<4x256xf32>
    %544 = vector.broadcast %542 : vector<1x256xf32> to vector<4x256xf32>
    %545 = arith.mulf %543, %544 : vector<4x256xf32>
    %546 = arith.addf %531, %545 : vector<4x256xf32>
    %547 = vector.extract_strided_slice %4 {offsets = [0, 33], sizes = [4, 1], strides = [1, 1]} : vector<4x36xf32> to vector<4x1xf32>
    %548 = vector.extract_strided_slice %540 {offsets = [1, 0], sizes = [1, 256], strides = [1, 1]} : vector<4x256xf32> to vector<1x256xf32>
    %549 = vector.broadcast %547 : vector<4x1xf32> to vector<4x256xf32>
    %550 = vector.broadcast %548 : vector<1x256xf32> to vector<4x256xf32>
    %551 = arith.mulf %549, %550 : vector<4x256xf32>
    %552 = arith.addf %546, %551 : vector<4x256xf32>
    %553 = vector.extract_strided_slice %4 {offsets = [0, 34], sizes = [4, 1], strides = [1, 1]} : vector<4x36xf32> to vector<4x1xf32>
    %554 = vector.extract_strided_slice %540 {offsets = [2, 0], sizes = [1, 256], strides = [1, 1]} : vector<4x256xf32> to vector<1x256xf32>
    %555 = vector.broadcast %553 : vector<4x1xf32> to vector<4x256xf32>
    %556 = vector.broadcast %554 : vector<1x256xf32> to vector<4x256xf32>
    %557 = arith.mulf %555, %556 : vector<4x256xf32>
    %558 = arith.addf %552, %557 : vector<4x256xf32>
    %559 = vector.extract_strided_slice %4 {offsets = [0, 35], sizes = [4, 1], strides = [1, 1]} : vector<4x36xf32> to vector<4x1xf32>
    %560 = vector.extract_strided_slice %540 {offsets = [3, 0], sizes = [1, 256], strides = [1, 1]} : vector<4x256xf32> to vector<1x256xf32>
    %561 = vector.broadcast %559 : vector<4x1xf32> to vector<4x256xf32>
    %562 = vector.broadcast %560 : vector<1x256xf32> to vector<4x256xf32>
    %563 = arith.mulf %561, %562 : vector<4x256xf32>
    %564 = arith.addf %558, %563 : vector<4x256xf32>
    %565 = vector.broadcast %6 : vector<4x1xf32> to vector<4x256xf32>
    %566 = arith.addf %564, %565 : vector<4x256xf32>
    %567 = arith.addf %566, %1 : vector<4x256xf32>
    %c0_52 = arith.constant 0 : index
    %c0_53 = arith.constant 0 : index
    %c0_54 = arith.constant 0 : index
    %568 = vector.load %arg8[%c0_52, %c0_53, %c0_54] : memref<1x4x256xf32, #tpu.memory_space<vmem>>, vector<1x4x256xf32>
    %569 = vector.shape_cast %568 : vector<1x4x256xf32> to vector<4x256xf32>
    %570 = vector.shape_cast %567 : vector<4x256xf32> to vector<1x4x256xf32>
    tpu.vector_store %arg8[%c0_52, %c0_53, %c0_54], %570 {strides = array<i32>} : memref<1x4x256xf32, #tpu.memory_space<vmem>>, vector<1x4x256xf32>,
    %cst_55 = arith.constant 0.000000e+00 : f32
    %571 = vector.broadcast %cst_55 : f32 to vector<4x256xf32>
    %572 = arith.maximumf %1, %571 : vector<4x256xf32>
    %c0_56 = arith.constant 0 : index
    %c0_57 = arith.constant 0 : index
    %c0_58 = arith.constant 0 : index
    %573 = vector.load %arg7[%c0_56, %c0_57, %c0_58] : memref<1x4x256xf32, #tpu.memory_space<vmem>>, vector<1x4x256xf32>
    %574 = vector.shape_cast %573 : vector<1x4x256xf32> to vector<4x256xf32>
    %575 = vector.shape_cast %572 : vector<4x256xf32> to vector<1x4x256xf32>
    tpu.vector_store %arg7[%c0_56, %c0_57, %c0_58], %575 {strides = array<i32>} : memref<1x4x256xf32, #tpu.memory_space<vmem>>, vector<1x4x256xf32>,
    return
  }
  func.func @transform_0(%arg0: i32) -> (i32, i32, i32) {
    %c0_i32 = arith.constant 0 : i32
    %c0_i32_0 = arith.constant 0 : i32
    %c0_i32_1 = arith.constant 0 : i32
    return %arg0, %c0_i32, %c0_i32_0 : i32, i32, i32
  }
  func.func @transform_1(%arg0: i32) -> (i32, i32) {
    %c0_i32 = arith.constant 0 : i32
    %c0_i32_0 = arith.constant 0 : i32
    %c0_i32_1 = arith.constant 0 : i32
    return %c0_i32, %c0_i32_0 : i32, i32
  }
  func.func @transform_2(%arg0: i32) -> (i32, i32) {
    %c0_i32 = arith.constant 0 : i32
    %c0_i32_0 = arith.constant 0 : i32
    %c0_i32_1 = arith.constant 0 : i32
    return %c0_i32, %c0_i32_0 : i32, i32
  }
  func.func @transform_3(%arg0: i32) -> (i32, i32) {
    %c0_i32 = arith.constant 0 : i32
    %c0_i32_0 = arith.constant 0 : i32
    %c0_i32_1 = arith.constant 0 : i32
    return %c0_i32, %c0_i32_0 : i32, i32
  }
  func.func @transform_4(%arg0: i32) -> (i32, i32) {
    %c0_i32 = arith.constant 0 : i32
    %c0_i32_0 = arith.constant 0 : i32
    %c0_i32_1 = arith.constant 0 : i32
    return %c0_i32, %c0_i32_0 : i32, i32
  }
  func.func @transform_5(%arg0: i32) -> (i32, i32) {
    %c0_i32 = arith.constant 0 : i32
    %c0_i32_0 = arith.constant 0 : i32
    %c0_i32_1 = arith.constant 0 : i32
    return %c0_i32, %c0_i32_0 : i32, i32
  }
  func.func @transform_6(%arg0: i32) -> (i32, i32, i32) {
    %c0_i32 = arith.constant 0 : i32
    %c0_i32_0 = arith.constant 0 : i32
    %c0_i32_1 = arith.constant 0 : i32
    return %arg0, %c0_i32, %c0_i32_0 : i32, i32, i32
  }
  func.func @transform_7(%arg0: i32) -> (i32, i32, i32) {
    %c0_i32 = arith.constant 0 : i32
    %c0_i32_0 = arith.constant 0 : i32
    %c0_i32_1 = arith.constant 0 : i32
    return %arg0, %c0_i32, %c0_i32_0 : i32, i32, i32
  }
}

</mosaic_0001>

<bundles_post_ra>
// kernel: residual_block_forward.1
= control target key start
LH: loop header
LB: loop body
LE: loop exit
PB: predicated region body
PF: predicated region fallthrough
CT: control target
= control target key end

     0   :  { %s2031_s24 = smov 0   ;;  %s2700_s0 = inlined_call_operand.vmem [shape: f32[2,4,256], index: 0, kind: input, shape index: {}]   ;;  %s2701_s1 = inlined_call_operand.vmem [shape: f32[4,36], index: 1, kind: input, shape index: {}]   ;;  %s2702_s2 = inlined_call_operand.vmem [shape: f32[4,1], index: 2, kind: input, shape index: {}]   ;;  %s2703_s3 = inlined_call_operand.vmem [shape: f32[4,36], index: 3, kind: input, shape index: {}]   ;;  %s2704_s4 = inlined_call_operand.vmem [shape: f32[4,1], index: 4, kind: input, shape index: {}]   ;;  %s2705_s5 = inlined_call_operand.vmem [shape: s32[1,256], index: 5, kind: input, shape index: {}]   ;;  %s2706_s6 = inlined_call_operand.vmem [shape: f32[2,4,256], index: 6, kind: output, shape index: {0}]   ;;  %s2707_s7 = inlined_call_operand.vmem [shape: f32[2,4,256], index: 7, kind: output, shape index: {1}]  }
   0x1 LB: > { %s1794_s25 = sadd.s32 4294967295, %s1945_s24   ;;  %p1798_p0 = scmp.ge.s32.totalorder %s1945_s24, 1  ;;  %s1945_s24 = sphi %s2031_s24, %s18_s24  }
   0x2   : > { %p240_p1 = scmp.lt.s32.totalorder %s1945_s24, 3 }
   0x4   : > { %p241_p2 = pnand %p1798_p0, %p240_p1 }
   0x5   : > { %v2042_v0 = vld [vmem:[%s2701_s1] sm:$0xf] (!%p241_p2)  ;;  %p277_p3 = scmp.lt.s32.totalorder (!%p241_p2), %s1794_s25, 1  ;;  %v1947_v1 = vmov (!%p241_p2), 0   ;;  %v1948_v2 = vmov (!%p241_p2), 2   ;;  %v1949_v3 = vmov (!%p241_p2), 1   ;;  %v311_v43 = vlaneseq (!%p241_p2) }
   0x6   : > { %244 = sbr.rel (%p241_p2) target bundleno = 517 (0x205), region = 44  ;;  %1862 = vset.pattern.permute.xlu1 (!%p241_p2), %v1947_v1  ;;  %1864 = vset.pattern.permute.xlu0 (!%p241_p2), %v1948_v2  ;;  %s1950_s12 = smov (!%p241_p2), 17   ;;  %v1951_v7 = vmov (!%p241_p2), 3   ;;  %v1953_v8 = vmov (!%p241_p2), 4   ;;  %v1954_v9 = vmov (!%p241_p2), 5   ;;  %v1955_v10 = vmov (!%p241_p2), 6  }
   0x7   : > { %325 = vperm.xlu1 (!%p241_p2), %1862, %v2042_v0   ;;  %s1952_s13 = smov (!%p241_p2), 16   ;;  %s1956_s14 = smov (!%p241_p2), 15   ;;  %v1957_v11 = vmov (!%p241_p2), 8   ;;  %v1958_v12 = vmov (!%p241_p2), 7   ;;  %v1959_v13 = vmov (!%p241_p2), 9   ;;  %v1960_v14 = vmov (!%p241_p2), 11  }
   0x8   : > { %v1961_v15 = vmov (!%p241_p2), 12   ;;  %v1962_v16 = vmov (!%p241_p2), 10   ;;  %v1963_v17 = vmov (!%p241_p2), 15   ;;  %s1964_s15 = smov (!%p241_p2), 1   ;;  %v1965_v18 = vmov (!%p241_p2), 13   ;;  %s1967_s16 = smov (!%p241_p2), 127  }
   0x9   : > { %v1966_v19 = vmov (!%p241_p2), 18   ;;  %v1968_v20 = vmov (!%p241_p2), 21   ;;  %v1969_v21 = vmov (!%p241_p2), 14   ;;  %s1970_s17 = smov (!%p241_p2), 113   ;;  %v1971_v22 = vmov (!%p241_p2), 16   ;;  %s1976_s18 = smov (!%p241_p2), 112  }
   0xa   : > { %v1972_v23 = vmov (!%p241_p2), 24   ;;  %v1973_v24 = vmov (!%p241_p2), 17   ;;  %v1974_v25 = vmov (!%p241_p2), 27   ;;  %v1975_v26 = vmov (!%p241_p2), 19   ;;  %v2147_v33 = vld [vmem:[%s2703_s3] sm:$0xf] (!%p241_p2) }
   0xb   : > { %1863 = vset.pattern.permute.xlu1 (!%p241_p2), %v1949_v3  ;;  %v1977_v27 = vmov (!%p241_p2), 30   ;;  %v1978_v28 = vmov (!%p241_p2), 20   ;;  %v1979_v29 = vmov (!%p241_p2), 33   ;;  %v1980_v30 = vmov (!%p241_p2), 22   ;;  %s1989_s21 = smov (!%p241_p2), 111  }
   0xc   : > { %341 = vperm.xlu1 (!%p241_p2), %1863, %v2042_v0   ;;  %v1981_v31 = vmov (!%p241_p2), 34   ;;  %v1982_v32 = vmov (!%p241_p2), 23   ;;  %v1983_v34 = vmov (!%p241_p2), 25   ;;  %v1984_v35 = vmov (!%p241_p2), 26   ;;  %v293_v45 = vld [vmem:[%s2705_s5] sm:$0x3] (!%p241_p2) }
   0xd   : > { %s2719_s25 = smov (!%p277_p3, %s1794_s25), 1  ;;  %v1985_v36 = vmov 28   ;;  %v1986_v37 = vmov 29   ;;  %v1987_v38 = vmov 31   ;;  %v1988_v39 = vmov 32  }
   0xe   : > { %s2047_s28 = sshll.u32 %s2719_s25, 3  ;;  %v2708_v42 = vmov 35   ;;  %v2195_v46 = vshrl.u32 %v311_v43, 7  ;;  %v296_v48 = vld [vmem:[%s2702_s2] sm:$0xf]  ;;  %vm309_vm0 = vcmp.ge.s32.totalorder %v293_v45, 1 }
   0xf   : > { %s2053_s8 = scalar_lea.vmem %s2700_s0, %s2047_s28  ;;  %s286_s11 = scalar_lea.vmem %s2706_s6, %s2047_s28  ;;  %v310_v52 = vsel %vm309_vm0, 1, %v1947_v1  ;;  %vm304_vm1 = vcmask 138240   ;;  %vm392_vm4 = vcmask 130048   ;;  %vm470_vm5 = vcmp.lt.s32.totalorder %v293_v45, 15 }
  0x10   : > { %v2061_v4 = vld [vmem:[%s2053_s8] sm:$0xff]  ;;  %1865 = vset.pattern.permute.xlu1 %v1951_v7  ;;  %v2202_v50 = vsub.s32 1, %v2195_v46  ;;  %v2208_v53 = vsub.s32 0, %v2195_v46  ;;  %v2224_v61 = vsub.s32 2, %v2195_v46  ;;  %vm465_vm6 = vcmask 121856   ;;  %s291_s10 = scalar_lea.vmem %s2707_s7, %s2047_s28 }
  0x11   : > { %300 = vrot.lane.b32.xlu0 %v2061_v4, %s1950_s12  ;;  %v1704_v5 = vmax.f32 %v2061_v4, 0.0  ;;  %v2069_v6 = vcombine.high %v2061_v4, %v2061_v4  ;;  %373 = vperm.xlu1 %1865, %v2042_v0   ;;  %vm552_vm9 = vcmask 7168   ;;  %vm731_vm10 = vcmask 1039360  }
  0x12   : > { %v318_v55 = vrot.slane %v310_v52, %v2202_v50  ;;  %v314_v57 = vrot.slane %v310_v52, %v2208_v53  ;;  %vm806_vm11 = vcmask 924672   ;;  %vm881_vm12 = vcmask 916480  }
  0x13   : > { %1705 = vst [vmem:[%s286_s11] sm:$0xff] %v1704_v5  ;;  %vm954_vm13 = vcmask 908288  }
  0x14   : > { %vm2216_vm2 = vcmp.eq.s32.totalorder %v318_v55, 1  ;;  %vm2228_vm3 = vcmp.eq.s32.totalorder %v314_v57, 1 }
  0x15   : > { %302 = vrot.lane.b32.xlu0 %v2069_v6, %s1950_s12  ;;  %388 = vrot.lane.b32.xlu1 %v2061_v4, %s1952_s13 }
  0x16   : > { %1866 = vset.pattern.permute.xlu1 %v1953_v8 }
  0x19   : > { %357 = vperm.xlu0 %1864, %v2042_v0   ;;  %398 = vperm.xlu1 %1866, %v2042_v0  }
  0x1d   : > { %390 = vrot.lane.b32.xlu0 %v2069_v6, %s1952_s13  ;;  %1868 = vset.pattern.permute.xlu1 %v1955_v10 }
  0x1e   : > { %1867 = vset.pattern.permute.xlu0 %v1954_v9  ;;  %430 = vperm.xlu1 %1868, %v2042_v0  }
  0x21   : > { %414 = vperm.xlu0 %1867, %v2042_v0  }
  0x22   : > { %1869 = vset.pattern.permute.xlu1 %v1958_v12 }
  0x23   : > { %446 = vperm.xlu1 %1869, %v2042_v0  }
  0x25   : > { %461 = vrot.lane.b32.xlu0 %v2061_v4, %s1956_s14 }
  0x26   : > { %1870 = vset.pattern.permute.xlu0 %v1957_v11 }
  0x27   : > { %463 = vrot.lane.b32.xlu1 %v2069_v6, %s1956_s14 }
  0x28   : > { %1871 = vset.pattern.permute.xlu1 %v1959_v13 }
  0x29   : > { %485 = vperm.xlu0 %1870, %v2042_v0  }
  0x2b   : > { %501 = vperm.xlu1 %1871, %v2042_v0  }
  0x2d   : > { %1873 = vset.pattern.permute.xlu0 %v1960_v14 }
  0x2e   : > { %533 = vperm.xlu0 %1873, %v2042_v0  }
  0x2f   : > { %1872 = vset.pattern.permute.xlu1 %v1962_v16 }
  0x30   : > { %517 = vperm.xlu1 %1872, %v2042_v0  }
  0x32   : > { %1874 = vset.pattern.permute.xlu0 %v1961_v15 }
  0x33   : > { %560 = vperm.xlu0 %1874, %v2042_v0  }
  0x34   : > { %548 = vrot.lane.b32.xlu1 %v2061_v4, %s1964_s15 }
  0x35   : > { %1875 = vset.pattern.permute.xlu1 %v1965_v18 }
  0x37   : > { %1877 = vset.pattern.permute.xlu0 %v1963_v17 }
  0x38   : > { %608 = vperm.xlu0 %1877, %v2042_v0   ;;  %550 = vrot.lane.b32.xlu1 %v2069_v6, %s1964_s15 }
  0x3c   : > { %1880 = vset.pattern.permute.xlu0 %v1966_v19  ;;  %576 = vperm.xlu1 %1875, %v2042_v0  }
  0x3d   : > { %676 = vperm.xlu0 %1880, %v2042_v0  }
  0x40   : > { %1876 = vset.pattern.permute.xlu1 %v1969_v21 }
  0x41   : > { %729 = vrot.lane.b32.xlu0 %v2069_v6, %s1967_s16  ;;  %592 = vperm.xlu1 %1876, %v2042_v0  }
  0x42   : > { %1883 = vset.pattern.permute.xlu0 %v1968_v20 }
  0x45   : > { %755 = vperm.xlu0 %1883, %v2042_v0   ;;  %1878 = vset.pattern.permute.xlu1 %v1971_v22 }
  0x46   : > { %624 = vperm.xlu1 %1878, %v2042_v0  }
  0x49   : > { %802 = vrot.lane.b32.xlu0 %v2061_v4, %s1970_s17 }
  0x4a   : > { %1886 = vset.pattern.permute.xlu0 %v1972_v23  ;;  %1879 = vset.pattern.permute.xlu1 %v1973_v24 }
  0x4b   : > { %650 = vperm.xlu1 %1879, %v2042_v0  }
  0x4d   : > { %814 = vperm.xlu0 %1886, %v2042_v0  }
  0x4f   : > { %1881 = vset.pattern.permute.xlu1 %v1975_v26 }
  0x50   : > { %702 = vperm.xlu1 %1881, %v2042_v0  }
  0x51   : > { %1889 = vset.pattern.permute.xlu0 %v1974_v25 }
  0x52   : > { %862 = vperm.xlu0 %1889, %v2042_v0  }
  0x54   : > { %727 = vrot.lane.b32.xlu1 %v2061_v4, %s1967_s16 }
  0x55   : > { %1882 = vset.pattern.permute.xlu1 %v1978_v28 }
  0x56   : > { %877 = vrot.lane.b32.xlu0 %v2061_v4, %s1976_s18 }
  0x57   : > { %1892 = vset.pattern.permute.xlu0 %v1977_v27 }
  0x58   : > { %739 = vperm.xlu1 %1882, %v2042_v0  }
  0x5a   : > { %919 = vperm.xlu0 %1892, %v2042_v0  }
  0x5c   : > { %1884 = vset.pattern.permute.xlu1 %v1980_v30 }
  0x5d   : > { %771 = vperm.xlu1 %1884, %v2042_v0  }
  0x5e   : > { %1895 = vset.pattern.permute.xlu0 %v1979_v29 }
  0x5f   : > { %978 = vperm.xlu0 %1895, %v2042_v0  }
  0x61   : > { %1885 = vset.pattern.permute.xlu1 %v1982_v32 }
  0x62   : > { %787 = vperm.xlu1 %1885, %v2042_v0  }
  0x63   : > { %1896 = vset.pattern.permute.xlu0 %v1981_v31 }
  0x64   : > { %994 = vperm.xlu0 %1896, %v2042_v0  }
  0x66   : > { %804 = vrot.lane.b32.xlu1 %v2069_v6, %s1970_s17 }
  0x67   : > { %1887 = vset.pattern.permute.xlu1 %v1983_v34 }
  0x68   : > { %1899 = vset.pattern.permute.xlu0 %v1947_v1 }
  0x69   : > { %1048 = vperm.xlu0 %1899, %v2147_v33  }
  0x6a   : > { %830 = vperm.xlu1 %1887, %v2042_v0  }
  0x6d   : > { %1902 = vset.pattern.permute.xlu0 %v1951_v7 }
  0x6e   : > { %1096 = vperm.xlu0 %1902, %v2147_v33   ;;  %1888 = vset.pattern.permute.xlu1 %v1984_v35 }
  0x6f   : > { %846 = vperm.xlu1 %1888, %v2042_v0  }
  0x72   : > { %1903 = vset.pattern.permute.xlu0 %v1953_v8 }
  0x73   : > { %1120 = vperm.xlu0 %1903, %v2147_v33   ;;  %1890 = vset.pattern.permute.xlu1 %v1985_v36 }
  0x74   : > { %887 = vperm.xlu1 %1890, %v2042_v0  }
  0x77   : > { %1906 = vset.pattern.permute.xlu0 %v1958_v12 }
  0x78   : > { %1168 = vperm.xlu0 %1906, %v2147_v33   ;;  %1891 = vset.pattern.permute.xlu1 %v1986_v37 }
  0x79   : > { %903 = vperm.xlu1 %1891, %v2042_v0  }
  0x7c   : > { %1907 = vset.pattern.permute.xlu0 %v1957_v11 }
  0x7d   : > { %1194 = vperm.xlu0 %1907, %v2147_v33   ;;  %879 = vrot.lane.b32.xlu1 %v2069_v6, %s1976_s18 }
  0x7e   : > { %1893 = vset.pattern.permute.xlu1 %v1987_v38 }
  0x81   : > { %1910 = vset.pattern.permute.xlu0 %v1960_v14  ;;  %935 = vperm.xlu1 %1893, %v2042_v0  }
  0x82   : > { %1242 = vperm.xlu0 %1910, %v2147_v33  }
  0x83   : > { %v301_v49 = vpop.permute.xlu0 %300 }
  0x85   : > { %1894 = vset.pattern.permute.xlu1 %v1988_v39 }
  0x86   : > { %1913 = vset.pattern.permute.xlu0 %v1969_v21  ;;  %v2179_v40 = vpop.permute.xlu1 %325  ;;  %962 = vperm.xlu1 %1894, %v2042_v0  }
  0x87   : > { %1300 = vperm.xlu0 %1913, %v2147_v33   ;;  %v303_v54 = vpop.permute.xlu0 %302 }
  0x88   : > { %v305_v60 = vsel %vm304_vm1, %v301_v49, %v303_v54 }
  0x8a   : > { %950 = vrot.lane.b32.xlu1 %v2061_v4, %s1989_s21 }
  0x8b   : > { %1916 = vset.pattern.permute.xlu0 %v1973_v24  ;;  %v342_v41 = vpop.permute.xlu1 %341  ;;  %1897 = vset.pattern.permute.xlu1 %v2708_v42  ;;  %v2244_v24 = vsub.s32 3, %v2195_v46 }
  0x8c   : > { %1348 = vperm.xlu0 %1916, %v2147_v33  }
  0x8e   : > { %952 = vrot.lane.b32.xlu1 %v2069_v6, %s1989_s21 }
  0x90   : > { %1919 = vset.pattern.permute.xlu0 %v1978_v28  ;;  %v2189_v44 = vpop.permute.xlu1 %373 }
  0x92   : > { %1010 = vperm.xlu1 %1897, %v2042_v0   ;;  %v308_v0 = vsel %vm304_vm1, 0.0, %v301_v49 }
  0x94   : > { %v389_v47 = vpop.permute.xlu1 %388 }
  0x95   : > { %v396_v45 = vsel %vm392_vm4, 0.0, %v389_v47 }
  0x96   : > { %1898 = vset.pattern.permute.xlu1 %v1947_v1 }
  0x97   : > { %1027 = vperm.xlu1 %1898, %v296_v48  }
  0x98   : > { %v2204_v51 = vpop.permute.xlu1 %398  ;;  %v358_v58 = vpop.permute.xlu0 %357 }
  0x9b   : > { %1900 = vset.pattern.permute.xlu1 %v1949_v3  ;;  %v322_v3 = vsel %vm2216_vm2, %v305_v60, 0.0 }
  0x9c   : > { %1064 = vperm.xlu1 %1900, %v2147_v33   ;;  %v351_v5 = vrot.slane %v322_v3, %v2202_v50  ;;  %v391_v7 = vpop.permute.xlu0 %390  ;;  %v335_v8 = vrot.slane %v322_v3, %v2208_v53  ;;  %v367_v11 = vrot.slane %v322_v3, %v2224_v61  ;;  %v383_v60 = vrot.slane %v322_v3, %v2244_v24 }
  0x9d   : > { %v2213_v56 = vpop.permute.xlu1 %430  ;;  %v393_v43 = vsel %vm392_vm4, %v389_v47, %v391_v7  ;;  %v404_v47 = vrot.slane %v396_v45, %v2208_v53 }
  0x9e   : > { %v353_v21 = vmul.f32 %v351_v5, %v342_v41  ;;  %v337_v48 = vmul.f32 %v335_v8, %v2179_v40  ;;  %v369_v49 = vmul.f32 %v367_v11, %v358_v58  ;;  %v471_v8 = vsel %vm470_vm5, 1, %v1947_v1 }
  0x9f   : > { %v385_v3 = vmul.f32 %v383_v60, %v2189_v44 }
  0xa0   : > { %1901 = vset.pattern.permute.xlu1 %v1948_v2  ;;  %v321_v2 = vsel %vm2228_vm3, %v308_v0, 0.0  ;;  %v415_v55 = vpop.permute.xlu0 %414  ;;  %v355_v57 = vadd.f32 %v353_v21, %v337_v48  ;;  %v408_v0 = vrot.slane %v393_v43, %v2208_v53 }
  0xa1   : > { %1080 = vperm.xlu1 %1901, %v2147_v33   ;;  %v347_v14 = vrot.slane %v321_v2, %v2202_v50  ;;  %v331_v28 = vrot.slane %v321_v2, %v2208_v53 }
  0xa2   : > { %v2226_v62 = vpop.permute.xlu1 %446  ;;  %v371_v11 = vadd.f32 %v369_v49, %v355_v57  ;;  %v410_v21 = vmul.f32 %v408_v0, %v2204_v51  ;;  %v475_v0 = vrot.slane %v471_v8, %v2208_v53 }
  0xa3   : > { %v352_v54 = vmul.f32 %v347_v14, %v342_v41  ;;  %v336_v5 = vmul.f32 %v331_v28, %v2179_v40  ;;  %v379_v41 = vrot.slane %v321_v2, %v2244_v24  ;;  %v424_v40 = vrot.slane %v393_v43, %v2202_v50 }
  0xa4   : > { %v462_v28 = vpop.permute.xlu0 %461  ;;  %vm2289_vm8 = vcmp.eq.s32.totalorder %v475_v0, 1 }
  0xa5   : > { %1904 = vset.pattern.permute.xlu1 %v1954_v9  ;;  %v363_v9 = vrot.slane %v321_v2, %v2224_v61  ;;  %v354_v42 = vadd.f32 %v352_v54, %v336_v5  ;;  %v384_v48 = vmul.f32 %v379_v41, %v2189_v44  ;;  %v426_v57 = vmul.f32 %v424_v40, %v415_v55 }
  0xa6   : > { %1136 = vperm.xlu1 %1904, %v2147_v33   ;;  %v464_v12 = vpop.permute.xlu1 %463  ;;  %v420_v44 = vrot.slane %v396_v45, %v2202_v50 }
  0xa7   : > { %v368_v7 = vmul.f32 %v363_v9, %v358_v58  ;;  %v387_v9 = vadd.f32 %v385_v3, %v371_v11 }
  0xa8   : > { %v425_v41 = vmul.f32 %v420_v44, %v415_v55 }
  0xa9   : > { %v370_v58 = vadd.f32 %v368_v7, %v354_v42  ;;  %v412_v54 = vadd.f32 %v410_v21, %v387_v9  ;;  %v409_v42 = vmul.f32 %v404_v47, %v2204_v51  ;;  %v469_v21 = vsel %vm465_vm6, 0.0, %v462_v28 }
  0xaa   : > { %1905 = vset.pattern.permute.xlu1 %v1955_v10  ;;  %v2251_v52 = vpop.permute.xlu1 %501  ;;  %v479_v10 = vrot.slane %v471_v8, %v2202_v50  ;;  %v482_v55 = vsel %vm2289_vm8, %v469_v21, 0.0 }
  0xab   : > { %1152 = vperm.xlu1 %1905, %v2147_v33   ;;  %v386_v60 = vadd.f32 %v384_v48, %v370_v58  ;;  %v428_v11 = vadd.f32 %v426_v57, %v412_v54  ;;  %v436_v58 = vrot.slane %v396_v45, %v2224_v61 }
  0xac   : > { %vm2269_vm7 = vcmp.eq.s32.totalorder %v479_v10, 1 }
  0xad   : > { %v411_v8 = vadd.f32 %v409_v42, %v386_v60  ;;  %v441_v54 = vmul.f32 %v436_v58, %v2213_v56  ;;  %v491_v42 = vrot.slane %v482_v55, %v2208_v53 }
  0xaf   : > { %1908 = vset.pattern.permute.xlu1 %v1959_v13  ;;  %v2262_v14 = vpop.permute.xlu1 %517  ;;  %v466_v13 = vsel %vm465_vm6, %v462_v28, %v464_v12  ;;  %v440_v12 = vrot.slane %v393_v43, %v2224_v61  ;;  %v427_v48 = vadd.f32 %v425_v41, %v411_v8  ;;  %v452_v28 = vrot.slane %v396_v45, %v2244_v24 }
  0xb0   : > { %1210 = vperm.xlu1 %1908, %v2147_v33   ;;  %v2280_v5 = vsel %vm2269_vm7, %v466_v13, 0.0  ;;  %v507_v45 = vrot.slane %v482_v55, %v2202_v50 }
  0xb1   : > { %v442_v10 = vmul.f32 %v440_v12, %v2213_v56  ;;  %v495_v51 = vrot.slane %v2280_v5, %v2208_v53  ;;  %v457_v60 = vmul.f32 %v452_v28, %v2226_v62  ;;  %v443_v56 = vadd.f32 %v441_v54, %v427_v48 }
  0xb2   : > { %v512_v21 = vmul.f32 %v507_v45, %v2251_v52 }
  0xb3   : > { %v549_v49 = vpop.permute.xlu1 %548  ;;  %v444_v9 = vadd.f32 %v442_v10, %v428_v11  ;;  %v527_v10 = vrot.slane %v2280_v5, %v2224_v61 }
  0xb4   : > { %1909 = vset.pattern.permute.xlu1 %v1962_v16  ;;  %v456_v16 = vrot.slane %v393_v43, %v2244_v24  ;;  %v486_v43 = vpop.permute.xlu0 %485  ;;  %v556_v41 = vsel %vm552_vm9, 0.0, %v549_v49 }
  0xb5   : > { %1226 = vperm.xlu1 %1909, %v2147_v33   ;;  %v497_v13 = vmul.f32 %v495_v51, %v486_v43  ;;  %v529_v8 = vmul.f32 %v527_v10, %v2262_v14  ;;  %v659_v10 = vsub.s32 5, %v2195_v46 }
  0xb6   : > { %v458_v40 = vmul.f32 %v456_v16, %v2226_v62  ;;  %v496_v16 = vmul.f32 %v491_v42, %v486_v43  ;;  %v523_v62 = vrot.slane %v482_v55, %v2224_v61  ;;  %v543_v43 = vrot.slane %v2280_v5, %v2244_v24 }
  0xb7   : > { %v551_v7 = vpop.permute.xlu1 %550 }
  0xb8   : > { %v460_v57 = vadd.f32 %v458_v40, %v444_v9  ;;  %v553_v12 = vsel %vm552_vm9, %v549_v49, %v551_v7  ;;  %v534_v40 = vpop.permute.xlu0 %533  ;;  %v528_v48 = vmul.f32 %v523_v62, %v2262_v14  ;;  %v557_v49 = vsel %vm2228_vm3, %v556_v41, 0.0 }
  0xb9   : > { %1911 = vset.pattern.permute.xlu1 %v1961_v15  ;;  %v511_v15 = vrot.slane %v2280_v5, %v2202_v50  ;;  %v2316_v51 = vsel %vm2216_vm2, %v553_v12, 0.0  ;;  %v566_v5 = vrot.slane %v557_v49, %v2208_v53  ;;  %v633_v12 = vsub.s32 4, %v2195_v46 }
  0xba   : > { %1268 = vperm.xlu1 %1911, %v2147_v33   ;;  %v499_v0 = vadd.f32 %v497_v13, %v460_v57  ;;  %v570_v9 = vrot.slane %v2316_v51, %v2208_v53  ;;  %v545_v57 = vmul.f32 %v543_v43, %v534_v40  ;;  %v586_v14 = vrot.slane %v2316_v51, %v2202_v50 }
  0xbb   : > { %v577_v47 = vpop.permute.xlu1 %576  ;;  %v513_v11 = vmul.f32 %v511_v15, %v2251_v52 }
  0xbc   : > { %v561_v28 = vpop.permute.xlu0 %560  ;;  %v588_v62 = vmul.f32 %v586_v14, %v577_v47 }
  0xbd   : > { %v515_v7 = vadd.f32 %v513_v11, %v499_v0  ;;  %v572_v15 = vmul.f32 %v570_v9, %v561_v28 }
  0xbe   : > { %1912 = vset.pattern.permute.xlu1 %v1965_v18  ;;  %v459_v18 = vadd.f32 %v457_v60, %v443_v56  ;;  %v582_v56 = vrot.slane %v557_v49, %v2202_v50 }
  0xbf   : > { %1284 = vperm.xlu1 %1912, %v2147_v33   ;;  %v531_v54 = vadd.f32 %v529_v8, %v515_v7  ;;  %v598_v7 = vrot.slane %v557_v49, %v2224_v61  ;;  %v602_v8 = vrot.slane %v2316_v51, %v2224_v61 }
  0xc0   : > { %v593_v44 = vpop.permute.xlu1 %592  ;;  %v498_v13 = vadd.f32 %v496_v16, %v459_v18  ;;  %v587_v16 = vmul.f32 %v582_v56, %v577_v47  ;;  %v609_v41 = vpop.permute.xlu0 %608  ;;  %v656_v47 = vrot.slane %v2061_v4, %v2202_v50 }
  0xc1   : > { %v603_v9 = vmul.f32 %v598_v7, %v593_v44 }
  0xc2   : > { %v514_v52 = vadd.f32 %v512_v21, %v498_v13  ;;  %v634_v21 = vrot.slane %v2061_v4, %v633_v12  ;;  %v604_v13 = vmul.f32 %v602_v8, %v593_v44 }
  0xc3   : > { %1914 = vset.pattern.permute.xlu1 %v1963_v17  ;;  %v539_v17 = vrot.slane %v482_v55, %v2244_v24  ;;  %v547_v55 = vadd.f32 %v545_v57, %v531_v54  ;;  %v614_v54 = vrot.slane %v557_v49, %v2244_v24  ;;  %v660_v57 = vrot.slane %v2061_v4, %v659_v10 }
  0xc4   : > { %1316 = vperm.xlu1 %1914, %v2147_v33   ;;  %v530_v0 = vadd.f32 %v528_v48, %v514_v52  ;;  %v618_v52 = vrot.slane %v2316_v51, %v2244_v24  ;;  %v711_v49 = vsub.s32 7, %v2195_v46 }
  0xc5   : > { %v2323_v58 = vpop.permute.xlu1 %624  ;;  %v544_v42 = vmul.f32 %v539_v17, %v534_v40  ;;  %v574_v45 = vadd.f32 %v572_v15, %v547_v55  ;;  %v685_v17 = vsub.s32 6, %v2195_v46  ;;  %v619_v51 = vmul.f32 %v614_v54, %v609_v41 }
  0xc6   : > { %v620_v12 = vmul.f32 %v618_v52, %v609_v41  ;;  %v670_v56 = vrot.slane %v660_v57, %v2202_v50  ;;  %v712_v8 = vrot.slane %v2061_v4, %v711_v49 }
  0xc7   : > { %v546_v11 = vadd.f32 %v544_v42, %v530_v0  ;;  %v590_v43 = vadd.f32 %v588_v62, %v574_v45  ;;  %v644_v42 = vrot.slane %v634_v21, %v2208_v53  ;;  %v682_v0 = vrot.slane %v2061_v4, %v2224_v61 }
  0xc8   : > { %1915 = vset.pattern.permute.xlu1 %v1971_v22  ;;  %v571_v22 = vmul.f32 %v566_v5, %v561_v28  ;;  %v677_v5 = vpop.permute.xlu0 %676  ;;  %v686_v55 = vrot.slane %v2061_v4, %v685_v17 }
  0xc9   : > { %1332 = vperm.xlu1 %1915, %v2147_v33   ;;  %v606_v15 = vadd.f32 %v604_v13, %v590_v43  ;;  %v646_v62 = vmul.f32 %v644_v42, %v2323_v58  ;;  %v692_v7 = vrot.slane %v682_v0, %v2224_v61 }
  0xca   : > { %v651_v60 = vpop.permute.xlu1 %650  ;;  %v573_v40 = vadd.f32 %v571_v22, %v546_v11  ;;  %v666_v22 = vrot.slane %v656_v47, %v2202_v50  ;;  %v696_v46 = vrot.slane %v686_v55, %v2224_v61  ;;  %v722_v47 = vrot.slane %v712_v8, %v2244_v24 }
  0xcb   : > { %v622_v10 = vadd.f32 %v620_v12, %v606_v15 }
  0xcc   : > { %v589_v28 = vadd.f32 %v587_v16, %v573_v40  ;;  %v730_v45 = vpop.permute.xlu0 %729  ;;  %v671_v41 = vmul.f32 %v666_v22, %v651_v60 }
  0xcd   : > { %1917 = vset.pattern.permute.xlu1 %v1966_v19  ;;  %v630_v19 = vrot.slane %v2061_v4, %v2208_v53  ;;  %v735_v40 = vsel %vm731_vm10, %v730_v45, 0.0  ;;  %v648_v13 = vadd.f32 %v646_v62, %v622_v10 }
  0xce   : > { %1364 = vperm.xlu1 %1917, %v2147_v33   ;;  %v605_v44 = vadd.f32 %v603_v9, %v589_v28  ;;  %v737_v54 = vsel %vm2269_vm7, %v735_v40, 0.0  ;;  %v698_v28 = vmul.f32 %v696_v46, %v677_v5 }
  0xcf   : > { %v2343_v18 = vpop.permute.xlu1 %702  ;;  %v765_v22 = vrot.slane %v737_v54, %v2202_v50 }
  0xd0   : > { %v621_v11 = vadd.f32 %v619_v51, %v605_v44  ;;  %v749_v44 = vrot.slane %v737_v54, %v2208_v53  ;;  %v724_v0 = vmul.f32 %v722_v47, %v2343_v18  ;;  %v756_v55 = vpop.permute.xlu0 %755 }
  0xd2   : > { %1918 = vset.pattern.permute.xlu1 %v1975_v26  ;;  %v640_v26 = vrot.slane %v630_v19, %v2208_v53  ;;  %v672_v19 = vmul.f32 %v670_v56, %v651_v60  ;;  %v697_v60 = vmul.f32 %v692_v7, %v677_v5 }
  0xd3   : > { %1380 = vperm.xlu1 %1918, %v2147_v33   ;;  %v728_v48 = vpop.permute.xlu1 %727 }
  0xd4   : > { %v645_v16 = vmul.f32 %v640_v26, %v2323_v58  ;;  %v732_v21 = vsel %vm731_vm10, %v728_v48, %v730_v45  ;;  %v674_v52 = vadd.f32 %v672_v19, %v648_v13 }
  0xd5   : > { %v736_v17 = vsel %vm2289_vm8, %v732_v21, 0.0  ;;  %v797_v21 = vrot.slane %v737_v54, %v2244_v24 }
  0xd6   : > { %v647_v9 = vadd.f32 %v645_v16, %v621_v11  ;;  %v745_v57 = vrot.slane %v736_v17, %v2208_v53  ;;  %v700_v26 = vadd.f32 %v698_v28, %v674_v52  ;;  %v761_v45 = vrot.slane %v736_v17, %v2202_v50  ;;  %v803_v11 = vpop.permute.xlu0 %802 }
  0xd7   : > { %v740_v14 = vpop.permute.xlu1 %739  ;;  %1920 = vset.pattern.permute.xlu1 %v1968_v20  ;;  %v708_v20 = vrot.slane %v2061_v4, %v2244_v24  ;;  %v777_v19 = vrot.slane %v736_v17, %v2224_v61  ;;  %v793_v13 = vrot.slane %v736_v17, %v2244_v24 }
  0xd8   : > { %v673_v4 = vadd.f32 %v671_v41, %v647_v9  ;;  %v750_v51 = vmul.f32 %v745_v57, %v740_v14  ;;  %v751_v12 = vmul.f32 %v749_v44, %v740_v14  ;;  %v726_v5 = vadd.f32 %v724_v0, %v700_v26 }
  0xd9   : > { %v718_v58 = vrot.slane %v708_v20, %v2244_v24  ;;  %v781_v20 = vrot.slane %v737_v54, %v2224_v61  ;;  %v766_v8 = vmul.f32 %v761_v45, %v756_v55 }
  0xda   : > { %v699_v15 = vadd.f32 %v697_v60, %v673_v4  ;;  %v753_v46 = vadd.f32 %v751_v12, %v726_v5  ;;  %v815_v44 = vpop.permute.xlu0 %814 }
  0xdb   : > { %v723_v42 = vmul.f32 %v718_v58, %v2343_v18  ;;  %v767_v18 = vmul.f32 %v765_v22, %v756_v55 }
  0xdc   : > { %v772_v43 = vpop.permute.xlu1 %771 }
  0xdd   : > { %v725_v56 = vadd.f32 %v723_v42, %v699_v15  ;;  %v769_v9 = vadd.f32 %v767_v18, %v753_v46  ;;  %v782_v47 = vmul.f32 %v777_v19, %v772_v43  ;;  %v783_v4 = vmul.f32 %v781_v20, %v772_v43 }
  0xde   : > { %v863_v22 = vpop.permute.xlu0 %862 }
  0xdf   : > { %v752_v7 = vadd.f32 %v750_v51, %v725_v56  ;;  %v785_v26 = vadd.f32 %v783_v4, %v769_v9 }
  0xe1   : > { %v788_v48 = vpop.permute.xlu1 %787  ;;  %v768_v40 = vadd.f32 %v766_v8, %v752_v7 }
  0xe2   : > { %v798_v28 = vmul.f32 %v793_v13, %v788_v48  ;;  %v799_v57 = vmul.f32 %v797_v21, %v788_v48  ;;  %v878_v18 = vpop.permute.xlu0 %877 }
  0xe3   : > { %v784_v15 = vadd.f32 %v782_v47, %v768_v40 }
  0xe5   : > { %v805_v49 = vpop.permute.xlu1 %804  ;;  %v800_v54 = vadd.f32 %v798_v28, %v784_v15 }
  0xe6   : > { %v807_v10 = vsel %vm806_vm11, %v803_v11, %v805_v49  ;;  %v810_v16 = vsel %vm806_vm11, %v805_v49, 0.0  ;;  %v801_v49 = vadd.f32 %v799_v57, %v785_v26 }
  0xe7   : > { %v811_v14 = vsel %vm2228_vm3, %v807_v10, 0.0  ;;  %v812_v41 = vsel %vm2216_vm2, %v810_v16, 0.0 }
  0xe8   : > { %v820_v52 = vrot.slane %v811_v14, %v2208_v53  ;;  %v824_v60 = vrot.slane %v812_v41, %v2208_v53  ;;  %v840_v51 = vrot.slane %v812_v41, %v2202_v50  ;;  %v836_v17 = vrot.slane %v811_v14, %v2202_v50 }
  0xe9   : > { %v831_v62 = vpop.permute.xlu1 %830  ;;  %v856_v48 = vrot.slane %v812_v41, %v2224_v61  ;;  %v852_v11 = vrot.slane %v811_v14, %v2224_v61  ;;  %v868_v8 = vrot.slane %v811_v14, %v2244_v24  ;;  %v872_v19 = vrot.slane %v812_v41, %v2244_v24 }
  0xea   : > { %v825_v42 = vmul.f32 %v820_v52, %v815_v44  ;;  %v826_v0 = vmul.f32 %v824_v60, %v815_v44  ;;  %v841_v5 = vmul.f32 %v836_v17, %v831_v62  ;;  %v842_v45 = vmul.f32 %v840_v51, %v831_v62  ;;  %v920_v17 = vpop.permute.xlu0 %919 }
  0xeb   : > { %v873_v52 = vmul.f32 %v868_v8, %v863_v22  ;;  %v874_v60 = vmul.f32 %v872_v19, %v863_v22 }
  0xec   : > { %v827_v12 = vadd.f32 %v825_v42, %v800_v54  ;;  %v828_v43 = vadd.f32 %v826_v0, %v801_v49 }
  0xee   : > { %v847_v58 = vpop.permute.xlu1 %846  ;;  %v843_v10 = vadd.f32 %v841_v5, %v827_v12  ;;  %v844_v16 = vadd.f32 %v842_v45, %v828_v43 }
  0xef   : > { %v857_v7 = vmul.f32 %v852_v11, %v847_v58  ;;  %v858_v46 = vmul.f32 %v856_v48, %v847_v58 }
  0xf1   : > { %v859_v13 = vadd.f32 %v857_v7, %v843_v10  ;;  %v860_v47 = vadd.f32 %v858_v46, %v844_v16  ;;  %v979_v46 = vpop.permute.xlu0 %978 }
  0xf3   : > { %v888_v55 = vpop.permute.xlu1 %887  ;;  %v875_v57 = vadd.f32 %v873_v52, %v859_v13  ;;  %v876_v44 = vadd.f32 %v874_v60, %v860_v47 }
  0xf8   : > { %v904_v56 = vpop.permute.xlu1 %903 }
  0xfc   : > { %v880_v20 = vpop.permute.xlu1 %879 }
  0xfd   : > { %v882_v21 = vsel %vm881_vm12, %v878_v18, %v880_v20  ;;  %v885_v40 = vsel %vm881_vm12, %v880_v20, 0.0 }
  0xfe   : > { %v893_v62 = vrot.slane %v882_v21, %v2208_v53  ;;  %v897_v9 = vrot.slane %v885_v40, %v2208_v53  ;;  %v909_v14 = vrot.slane %v882_v21, %v2202_v50  ;;  %v913_v41 = vrot.slane %v885_v40, %v2202_v50 }
  0xff   : > { %v925_v49 = vrot.slane %v882_v21, %v2224_v61  ;;  %v929_v51 = vrot.slane %v885_v40, %v2224_v61  ;;  %v941_v48 = vrot.slane %v882_v21, %v2244_v24 }
 0x100   : > { %v936_v4 = vpop.permute.xlu1 %935  ;;  %v898_v58 = vmul.f32 %v893_v62, %v888_v55  ;;  %v899_v28 = vmul.f32 %v897_v9, %v888_v55  ;;  %v914_v0 = vmul.f32 %v909_v14, %v904_v56  ;;  %v915_v54 = vmul.f32 %v913_v41, %v904_v56 }
 0x101   : > { %v945_v55 = vrot.slane %v885_v40, %v2244_v24  ;;  %v930_v5 = vmul.f32 %v925_v49, %v920_v17  ;;  %v931_v45 = vmul.f32 %v929_v51, %v920_v17  ;;  %v946_v18 = vmul.f32 %v941_v48, %v936_v4 }
 0x102   : > { %v900_v15 = vadd.f32 %v898_v58, %v875_v57  ;;  %v901_v26 = vadd.f32 %v899_v28, %v876_v44 }
 0x103   : > { %v947_v20 = vmul.f32 %v945_v55, %v936_v4 }
 0x104   : > { %v916_v12 = vadd.f32 %v914_v0, %v900_v15  ;;  %v917_v43 = vadd.f32 %v915_v54, %v901_v26  ;;  %v995_v26 = vpop.permute.xlu0 %994 }
 0x105   : > { %v963_v42 = vpop.permute.xlu1 %962 }
 0x106   : > { %v932_v11 = vadd.f32 %v930_v5, %v916_v12  ;;  %v933_v10 = vadd.f32 %v931_v45, %v917_v43 }
 0x108   : > { %v948_v13 = vadd.f32 %v946_v18, %v932_v11  ;;  %v949_v47 = vadd.f32 %v947_v20, %v933_v10 }
 0x109   : > { %v951_v22 = vpop.permute.xlu1 %950 }
 0x10d   : > { %v953_v16 = vpop.permute.xlu1 %952 }
 0x10e   : > { %v955_v56 = vsel %vm954_vm13, %v951_v22, %v953_v16  ;;  %v958_v7 = vsel %vm954_vm13, %v953_v16, 0.0 }
 0x10f   : > { %v959_v8 = vsel %vm2289_vm8, %v955_v56, 0.0  ;;  %v960_v19 = vsel %vm2269_vm7, %v958_v7, 0.0  ;;  %v297_v56 = vld [vmem:[%s2704_s4] sm:$0xf] }
 0x110   : > { %v968_v40 = vrot.slane %v959_v8, %v2208_v53  ;;  %v972_v21 = vrot.slane %v960_v19, %v2208_v53  ;;  %v984_v62 = vrot.slane %v959_v8, %v2202_v50  ;;  %v988_v9 = vrot.slane %v960_v19, %v2202_v50 }
 0x111   : > { %v1000_v4 = vrot.slane %v959_v8, %v2224_v61  ;;  %v1004_v58 = vrot.slane %v960_v19, %v2224_v61  ;;  %v1016_v28 = vrot.slane %v959_v8, %v2244_v24  ;;  %v1020_v57 = vrot.slane %v960_v19, %v2244_v24  ;;  %v1011_v0 = vpop.permute.xlu1 %1010 }
 0x112   : > { %v973_v52 = vmul.f32 %v968_v40, %v963_v42  ;;  %v974_v60 = vmul.f32 %v972_v21, %v963_v42  ;;  %v989_v44 = vmul.f32 %v984_v62, %v979_v46  ;;  %v990_v14 = vmul.f32 %v988_v9, %v979_v46 }
 0x113   : > { %v1005_v51 = vmul.f32 %v1000_v4, %v995_v26  ;;  %v1006_v17 = vmul.f32 %v1004_v58, %v995_v26  ;;  %v1021_v12 = vmul.f32 %v1016_v28, %v1011_v0  ;;  %v1022_v42 = vmul.f32 %v1020_v57, %v1011_v0 }
 0x114   : > { %v975_v41 = vadd.f32 %v973_v52, %v948_v13  ;;  %v976_v15 = vadd.f32 %v974_v60, %v949_v47 }
 0x116   : > { %v991_v54 = vadd.f32 %v989_v44, %v975_v41  ;;  %v992_v49 = vadd.f32 %v990_v14, %v976_v15  ;;  %v1028_v55 = vpop.permute.xlu1 %1027 }
 0x118   : > { %v1007_v43 = vadd.f32 %v1005_v51, %v991_v54  ;;  %v1008_v22 = vadd.f32 %v1006_v17, %v992_v49 }
 0x11a   : > { %v1023_v5 = vadd.f32 %v1021_v12, %v1007_v43  ;;  %v1024_v45 = vadd.f32 %v1022_v42, %v1008_v22 }
 0x11c   : > { %v1030_v48 = vadd.f32 %v1028_v55, %v1023_v5  ;;  %v1031_v11 = vadd.f32 %v1028_v55, %v1024_v45 }
 0x11e   : > { %v2432_v10 = vmax.f32 %v1030_v48, 0.0  ;;  %v2434_v16 = vmax.f32 %v1031_v11, 0.0 }
 0x120   : > { %1038 = vrot.lane.b32.xlu1 %v2434_v16, %s1950_s12  ;;  %1036 = vrot.lane.b32.xlu0 %v2432_v10, %s1950_s12 }
 0x124   : > { %1111 = vrot.lane.b32.xlu1 %v2432_v10, %s1952_s13  ;;  %1257 = vrot.lane.b32.xlu0 %v2432_v10, %s1964_s15 }
 0x128   : > { %1113 = vrot.lane.b32.xlu1 %v2434_v16, %s1952_s13  ;;  %1406 = vperm.xlu0 %1919, %v2147_v33  }
 0x12c   : > { %1183 = vrot.lane.b32.xlu1 %v2432_v10, %s1956_s14  ;;  %1397 = vrot.lane.b32.xlu0 %v2434_v16, %s1967_s16 }
 0x12d   : > { %1922 = vset.pattern.permute.xlu0 %v1982_v32 }
 0x130   : > { %1185 = vrot.lane.b32.xlu1 %v2434_v16, %s1956_s14  ;;  %1454 = vperm.xlu0 %1922, %v2147_v33  }
 0x134   : > { %1422 = vperm.xlu1 %1920, %v2147_v33   ;;  %1469 = vrot.lane.b32.xlu0 %v2432_v10, %s1970_s17 }
 0x135   : > { %1925 = vset.pattern.permute.xlu0 %v1984_v35  ;;  %v2717_v35 = vmov 35  }
 0x138   : > { %1259 = vrot.lane.b32.xlu1 %v2434_v16, %s1964_s15  ;;  %1512 = vperm.xlu0 %1925, %v2147_v33  }
 0x139   : > { %1921 = vset.pattern.permute.xlu1 %v1980_v30  ;;  %v1065_v30 = vpop.permute.xlu1 %1064 }
 0x13c   : > { %1395 = vrot.lane.b32.xlu1 %v2432_v10, %s1967_s16  ;;  %1928 = vset.pattern.permute.xlu0 %v1986_v37 }
 0x13d   : > { %1568 = vperm.xlu0 %1928, %v2147_v33  }
 0x140   : > { %1438 = vperm.xlu1 %1921, %v2147_v33  }
 0x141   : > { %1929 = vset.pattern.permute.xlu0 %v1977_v27 }
 0x142   : > { %1584 = vperm.xlu0 %1929, %v2147_v33  }
 0x144   : > { %1923 = vset.pattern.permute.xlu1 %v1972_v23  ;;  %v1081_v23 = vpop.permute.xlu1 %1080 }
 0x145   : > { %1480 = vperm.xlu1 %1923, %v2147_v33  }
 0x146   : > { %1932 = vset.pattern.permute.xlu0 %v1979_v29 }
 0x147   : > { %1642 = vperm.xlu0 %1932, %v2147_v33  }
 0x148   : > { %v2485_v27 = vpop.permute.xlu1 %1136 }
 0x149   : > { %1924 = vset.pattern.permute.xlu1 %v1983_v34 }
 0x14a   : > { %1496 = vperm.xlu1 %1924, %v2147_v33  }
 0x14b   : > { %1933 = vset.pattern.permute.xlu0 %v1981_v31 }
 0x14c   : > { %1658 = vperm.xlu0 %1933, %v2147_v33   ;;  %v2490_v29 = vpop.permute.xlu1 %1152 }
 0x14e   : > { %1471 = vrot.lane.b32.xlu1 %v2434_v16, %s1970_s17 }
 0x14f   : > { %1926 = vset.pattern.permute.xlu1 %v1974_v25  ;;  %v1049_v25 = vpop.permute.xlu0 %1048 }
 0x150   : > { %1936 = vset.pattern.permute.xlu0 %v1947_v1  ;;  %v2495_v31 = vpop.permute.xlu1 %1210 }
 0x152   : > { %1528 = vperm.xlu1 %1926, %v2147_v33  }
 0x153   : > { %v1097_v32 = vpop.permute.xlu0 %1096 }
 0x154   : > { %v2499_v34 = vpop.permute.xlu1 %1226 }
 0x156   : > { %1927 = vset.pattern.permute.xlu1 %v1985_v36 }
 0x157   : > { %1552 = vperm.xlu1 %1927, %v2147_v33   ;;  %v1121_v36 = vpop.permute.xlu0 %1120 }
 0x158   : > { %v2504_v37 = vpop.permute.xlu1 %1268 }
 0x15b   : > { %1543 = vrot.lane.b32.xlu1 %v2432_v10, %s1976_s18 }
 0x15c   : > { %1930 = vset.pattern.permute.xlu1 %v1987_v38  ;;  %v2509_v38 = vpop.permute.xlu0 %1168 }
 0x15f   : > { %1545 = vrot.lane.b32.xlu1 %v2434_v16, %s1976_s18 }
 0x160   : > { %v2517_v7 = vpop.permute.xlu0 %1194 }
 0x163   : > { %1600 = vperm.xlu1 %1930, %v2147_v33  }
 0x164   : > { %v2521_v18 = vpop.permute.xlu0 %1242 }
 0x167   : > { %1931 = vset.pattern.permute.xlu1 %v1988_v39  ;;  %v2511_v39 = vpop.permute.xlu1 %1284 }
 0x168   : > { %1626 = vperm.xlu1 %1931, %v2147_v33  }
 0x16b   : > { %v2519_v46 = vpop.permute.xlu1 %1316 }
 0x16c   : > { %1615 = vrot.lane.b32.xlu1 %v2432_v10, %s1989_s21 }
 0x16d   : > { %1934 = vset.pattern.permute.xlu1 %v2717_v35 }
 0x16f   : > { %v2523_v20 = vpop.permute.xlu1 %1332 }
 0x170   : > { %1617 = vrot.lane.b32.xlu1 %v2434_v16, %s1989_s21 }
 0x173   : > { %v2527_v8 = vpop.permute.xlu1 %1364 }
 0x174   : > { %1674 = vperm.xlu1 %1934, %v2147_v33   ;;  %v2525_v33 = vpop.permute.xlu0 %1300 }
 0x177   : > { %v2531_v40 = vpop.permute.xlu1 %1380 }
 0x178   : > { %1935 = vset.pattern.permute.xlu1 %v1947_v1  ;;  %v2529_v19 = vpop.permute.xlu0 %1348 }
 0x179   : > { %1691 = vperm.xlu1 %1935, %v297_v56  }
 0x192   : > { %v1039_v21 = vpop.permute.xlu1 %1038  ;;  %v1037_v62 = vpop.permute.xlu0 %1036 }
 0x193   : > { %v1040_v1 = vsel %vm304_vm1, %v1037_v62, %v1039_v21  ;;  %v1043_v9 = vsel %vm304_vm1, 0.0, %v1037_v62 }
 0x194   : > { %v1044_v13 = vsel %vm2228_vm3, %v1043_v9, 0.0  ;;  %v1045_v47 = vsel %vm2216_vm2, %v1040_v1, 0.0 }
 0x195   : > { %v1054_v52 = vrot.slane %v1044_v13, %v2208_v53  ;;  %v1058_v60 = vrot.slane %v1045_v47, %v2208_v53  ;;  %v1070_v4 = vrot.slane %v1044_v13, %v2202_v50  ;;  %v1074_v58 = vrot.slane %v1045_v47, %v2202_v50 }
 0x196   : > { %v1086_v28 = vrot.slane %v1044_v13, %v2224_v61  ;;  %v1090_v57 = vrot.slane %v1045_v47, %v2224_v61  ;;  %v1102_v44 = vrot.slane %v1044_v13, %v2244_v24  ;;  %v1112_v14 = vpop.permute.xlu1 %1111  ;;  %v1106_v49 = vrot.slane %v1045_v47, %v2244_v24  ;;  %v2552_v62 = vpop.permute.xlu0 %1257 }
 0x197   : > { %v1059_v41 = vmul.f32 %v1054_v52, %v1049_v25  ;;  %v1060_v15 = vmul.f32 %v1058_v60, %v1049_v25  ;;  %v1075_v26 = vmul.f32 %v1070_v4, %v1065_v30  ;;  %v1076_v0 = vmul.f32 %v1074_v58, %v1065_v30 }
 0x198   : > { %v1091_v54 = vmul.f32 %v1086_v28, %v1081_v23  ;;  %v1092_v12 = vmul.f32 %v1090_v57, %v1081_v23  ;;  %v1118_v42 = vsel %vm392_vm4, 0.0, %v1112_v14  ;;  %v1107_v43 = vmul.f32 %v1102_v44, %v1097_v32 }
 0x199   : > { %v1077_v51 = vadd.f32 %v1075_v26, %v1059_v41  ;;  %v1078_v17 = vadd.f32 %v1076_v0, %v1060_v15  ;;  %v1126_v22 = vrot.slane %v1118_v42, %v2208_v53  ;;  %v1142_v48 = vrot.slane %v1118_v42, %v2202_v50 }
 0x19a   : > { %v1114_v55 = vpop.permute.xlu1 %1113  ;;  %v1108_v25 = vmul.f32 %v1106_v49, %v1097_v32  ;;  %v1158_v56 = vrot.slane %v1118_v42, %v2224_v61  ;;  %v1174_v52 = vrot.slane %v1118_v42, %v2244_v24  ;;  %v1264_v28 = vsel %vm552_vm9, 0.0, %v2552_v62 }
 0x19b   : > { %v1093_v5 = vadd.f32 %v1091_v54, %v1077_v51  ;;  %v1094_v45 = vadd.f32 %v1092_v12, %v1078_v17  ;;  %v1115_v11 = vsel %vm392_vm4, %v1112_v14, %v1114_v55  ;;  %v1131_v35 = vmul.f32 %v1126_v22, %v1121_v36 }
 0x19c   : > { %v1130_v23 = vrot.slane %v1115_v11, %v2208_v53  ;;  %v1146_v1 = vrot.slane %v1115_v11, %v2202_v50  ;;  %v1147_v47 = vmul.f32 %v1142_v48, %v2485_v27  ;;  %v1162_v32 = vrot.slane %v1115_v11, %v2224_v61 }
 0x19d   : > { %v1109_v30 = vadd.f32 %v1107_v43, %v1093_v5  ;;  %v1110_v21 = vadd.f32 %v1108_v25, %v1094_v45  ;;  %v1163_v58 = vmul.f32 %v1158_v56, %v2490_v29  ;;  %v1178_v41 = vrot.slane %v1115_v11, %v2244_v24 }
 0x19e   : > { %v1184_v9 = vpop.permute.xlu1 %1183  ;;  %v1132_v60 = vmul.f32 %v1130_v23, %v1121_v36  ;;  %v1148_v14 = vmul.f32 %v1146_v1, %v2485_v27  ;;  %v1179_v0 = vmul.f32 %v1174_v52, %v2509_v38  ;;  %v1164_v17 = vmul.f32 %v1162_v32, %v2490_v29 }
 0x19f   : > { %v1133_v13 = vadd.f32 %v1131_v35, %v1109_v30  ;;  %v1190_v57 = vsel %vm465_vm6, 0.0, %v1184_v9  ;;  %v1265_v55 = vsel %vm2228_vm3, %v1264_v28, 0.0  ;;  %v1180_v45 = vmul.f32 %v1178_v41, %v2509_v38 }
 0x1a0   : > { %v1134_v44 = vadd.f32 %v1132_v60, %v1110_v21  ;;  %v1191_v15 = vsel %vm2289_vm8, %v1190_v57, 0.0  ;;  %v1274_v23 = vrot.slane %v1265_v55, %v2208_v53 }
 0x1a1   : > { %v1149_v4 = vadd.f32 %v1147_v47, %v1133_v13  ;;  %v1200_v54 = vrot.slane %v1191_v15, %v2208_v53  ;;  %v1216_v49 = vrot.slane %v1191_v15, %v2202_v50  ;;  %v1232_v43 = vrot.slane %v1191_v15, %v2224_v61 }
 0x1a2   : > { %v1186_v26 = vpop.permute.xlu1 %1185  ;;  %v1150_v51 = vadd.f32 %v1148_v14, %v1134_v44  ;;  %v1248_v25 = vrot.slane %v1191_v15, %v2244_v24  ;;  %v1290_v47 = vrot.slane %v1265_v55, %v2202_v50  ;;  %v1306_v44 = vrot.slane %v1265_v55, %v2224_v61 }
 0x1a3   : > { %v1165_v36 = vadd.f32 %v1163_v58, %v1149_v4  ;;  %v1187_v12 = vsel %vm465_vm6, %v1184_v9, %v1186_v26  ;;  %v1205_v27 = vmul.f32 %v1200_v54, %v2517_v7  ;;  %v1221_v29 = vmul.f32 %v1216_v49, %v2495_v31 }
 0x1a4   : > { %v1192_v22 = vsel %vm2269_vm7, %v1187_v12, 0.0  ;;  %v1166_v5 = vadd.f32 %v1164_v17, %v1150_v51  ;;  %v1237_v9 = vmul.f32 %v1232_v43, %v2499_v34  ;;  %v1253_v60 = vmul.f32 %v1248_v25, %v2521_v18 }
 0x1a5   : > { %v1181_v42 = vadd.f32 %v1179_v0, %v1165_v36  ;;  %v1204_v48 = vrot.slane %v1192_v22, %v2208_v53  ;;  %v1220_v30 = vrot.slane %v1192_v22, %v2202_v50  ;;  %v1236_v21 = vrot.slane %v1192_v22, %v2224_v61 }
 0x1a6   : > { %v1182_v35 = vadd.f32 %v1180_v45, %v1166_v5  ;;  %v1295_v57 = vmul.f32 %v1290_v47, %v2511_v39  ;;  %v1322_v15 = vrot.slane %v1265_v55, %v2244_v24  ;;  %v1252_v0 = vrot.slane %v1192_v22, %v2244_v24 }
 0x1a7   : > { %v1207_v11 = vadd.f32 %v1205_v27, %v1181_v42  ;;  %v1206_v56 = vmul.f32 %v1204_v48, %v2517_v7  ;;  %v1222_v13 = vmul.f32 %v1220_v30, %v2495_v31  ;;  %v1238_v4 = vmul.f32 %v1236_v21, %v2499_v34  ;;  %v1407_v34 = vpop.permute.xlu0 %1406 }
 0x1a8   : > { %v1279_v7 = vmul.f32 %v1274_v23, %v2504_v37  ;;  %v1311_v31 = vmul.f32 %v1306_v44, %v2525_v33  ;;  %v1327_v54 = vmul.f32 %v1322_v15, %v2519_v46  ;;  %v1338_v17 = vrot.slane %v2432_v10, %v2208_v53 }
 0x1a9   : > { %v1223_v1 = vadd.f32 %v1221_v29, %v1207_v11  ;;  %v1208_v38 = vadd.f32 %v1206_v56, %v1182_v35  ;;  %v1254_v27 = vmul.f32 %v1252_v0, %v2521_v18  ;;  %v1354_v55 = vrot.slane %v2432_v10, %v2202_v50 }
 0x1aa   : > { %v1343_v5 = vmul.f32 %v1338_v17, %v2523_v20 }
 0x1ab   : > { %v1239_v52 = vadd.f32 %v1237_v9, %v1223_v1  ;;  %v1224_v32 = vadd.f32 %v1222_v13, %v1208_v38  ;;  %v1398_v48 = vpop.permute.xlu0 %1397  ;;  %v1359_v21 = vmul.f32 %v1354_v55, %v2529_v19  ;;  %v1370_v13 = vrot.slane %v2432_v10, %v2224_v61 }
 0x1ad   : > { %v1255_v58 = vadd.f32 %v1253_v60, %v1239_v52  ;;  %v1240_v28 = vadd.f32 %v1238_v4, %v1224_v32  ;;  %v1402_v52 = vsel %vm731_vm10, %v1398_v48, 0.0 }
 0x1ae   : > { %v1404_v44 = vsel %vm2269_vm7, %v1402_v52, 0.0 }
 0x1af   : > { %v1281_v14 = vadd.f32 %v1279_v7, %v1255_v58 }
 0x1b1   : > { %v1297_v41 = vadd.f32 %v1295_v57, %v1281_v14  ;;  %v1386_v57 = vrot.slane %v2432_v10, %v2244_v24  ;;  %v1416_v10 = vrot.slane %v1404_v44, %v2208_v53 }
 0x1b3   : > { %v2596_v26 = vpop.permute.xlu1 %1422  ;;  %v1313_v36 = vadd.f32 %v1311_v31, %v1297_v41  ;;  %v1391_v15 = vmul.f32 %v1386_v57, %v2531_v40 }
 0x1b5   : > { %v1329_v42 = vadd.f32 %v1327_v54, %v1313_v36  ;;  %v1455_v36 = vpop.permute.xlu0 %1454  ;;  %v1390_v54 = vrot.slane %v2434_v16, %v2244_v24 }
 0x1b7   : > { %v1260_v49 = vpop.permute.xlu1 %1259  ;;  %v1345_v30 = vadd.f32 %v1343_v5, %v1329_v42 }
 0x1b8   : > { %v1261_v51 = vsel %vm552_vm9, %v2552_v62, %v1260_v49  ;;  %v1256_v62 = vadd.f32 %v1254_v27, %v1240_v28 }
 0x1b9   : > { %v1266_v12 = vsel %vm2216_vm2, %v1261_v51, 0.0  ;;  %v1361_v47 = vadd.f32 %v1359_v21, %v1345_v30  ;;  %v1470_v5 = vpop.permute.xlu0 %1469 }
 0x1ba   : > { %v1278_v43 = vrot.slane %v1266_v12, %v2208_v53  ;;  %v1294_v22 = vrot.slane %v1266_v12, %v2202_v50  ;;  %v1310_v29 = vrot.slane %v1266_v12, %v2224_v61  ;;  %v1326_v56 = vrot.slane %v1266_v12, %v2244_v24 }
 0x1bb   : > { %v1396_v45 = vpop.permute.xlu1 %1395  ;;  %v1392_v12 = vmul.f32 %v1390_v54, %v2531_v40 }
 0x1bc   : > { %v1280_v11 = vmul.f32 %v1278_v43, %v2504_v37  ;;  %v1399_v25 = vsel %vm731_vm10, %v1396_v45, %v1398_v48  ;;  %v1296_v35 = vmul.f32 %v1294_v22, %v2511_v39  ;;  %v1312_v9 = vmul.f32 %v1310_v29, %v2525_v33 }
 0x1bd   : > { %v1403_v38 = vsel %vm2289_vm8, %v1399_v25, 0.0  ;;  %v1358_v37 = vrot.slane %v2434_v16, %v2202_v50  ;;  %v1342_v39 = vrot.slane %v2434_v16, %v2208_v53  ;;  %v1328_v32 = vmul.f32 %v1326_v56, %v2519_v46 }
 0x1be   : > { %v1282_v18 = vadd.f32 %v1280_v11, %v1256_v62  ;;  %v1375_v33 = vmul.f32 %v1370_v13, %v2527_v8  ;;  %v1412_v4 = vrot.slane %v1403_v38, %v2208_v53  ;;  %v1374_v46 = vrot.slane %v2434_v16, %v2224_v61 }
 0x1bf   : > { %v1439_v23 = vpop.permute.xlu1 %1438  ;;  %v1344_v7 = vmul.f32 %v1342_v39, %v2523_v20  ;;  %v1360_v41 = vmul.f32 %v1358_v37, %v2529_v19  ;;  %v1428_v51 = vrot.slane %v1403_v38, %v2202_v50  ;;  %v1418_v43 = vmul.f32 %v1416_v10, %v1407_v34 }
 0x1c0   : > { %v1298_v1 = vadd.f32 %v1296_v35, %v1282_v18  ;;  %v1377_v14 = vadd.f32 %v1375_v33, %v1361_v47  ;;  %v1417_v0 = vmul.f32 %v1412_v4, %v1407_v34  ;;  %v1376_v20 = vmul.f32 %v1374_v46, %v2527_v8  ;;  %v1513_v46 = vpop.permute.xlu0 %1512 }
 0x1c1   : > { %v1432_v22 = vrot.slane %v1404_v44, %v2202_v50  ;;  %v1433_v8 = vmul.f32 %v1428_v51, %v2596_v26  ;;  %v1444_v16 = vrot.slane %v1403_v38, %v2224_v61  ;;  %v1448_v45 = vrot.slane %v1404_v44, %v2224_v61 }
 0x1c2   : > { %v1314_v60 = vadd.f32 %v1312_v9, %v1298_v1  ;;  %v1393_v17 = vadd.f32 %v1391_v15, %v1377_v14  ;;  %v1464_v34 = vrot.slane %v1404_v44, %v2244_v24  ;;  %v1460_v21 = vrot.slane %v1403_v38, %v2244_v24 }
 0x1c3   : > { %v1434_v48 = vmul.f32 %v1432_v22, %v2596_v26  ;;  %v1450_v35 = vmul.f32 %v1448_v45, %v1439_v23  ;;  %v1449_v1 = vmul.f32 %v1444_v16, %v1439_v23 }
 0x1c4   : > { %v1330_v58 = vadd.f32 %v1328_v32, %v1314_v60  ;;  %v1481_v28 = vpop.permute.xlu1 %1480  ;;  %v1419_v27 = vadd.f32 %v1417_v0, %v1393_v17  ;;  %v1466_v13 = vmul.f32 %v1464_v34, %v1455_v36  ;;  %v1465_v52 = vmul.f32 %v1460_v21, %v1455_v36 }
 0x1c6   : > { %v1346_v31 = vadd.f32 %v1344_v7, %v1330_v58  ;;  %v1435_v25 = vadd.f32 %v1433_v8, %v1419_v27 }
 0x1c8   : > { %v1362_v49 = vadd.f32 %v1360_v41, %v1346_v31  ;;  %v1451_v47 = vadd.f32 %v1449_v1, %v1435_v25 }
 0x1c9   : > { %v1497_v19 = vpop.permute.xlu1 %1496 }
 0x1ca   : > { %v1378_v42 = vadd.f32 %v1376_v20, %v1362_v49  ;;  %v1467_v33 = vadd.f32 %v1465_v52, %v1451_v47 }
 0x1cc   : > { %v1394_v55 = vadd.f32 %v1392_v12, %v1378_v42 }
 0x1cd   : > { %v1472_v62 = vpop.permute.xlu1 %1471 }
 0x1ce   : > { %v1420_v11 = vadd.f32 %v1418_v43, %v1394_v55  ;;  %v1473_v29 = vsel %vm806_vm11, %v1470_v5, %v1472_v62  ;;  %v1476_v40 = vsel %vm806_vm11, %v1472_v62, 0.0  ;;  %v1569_v5 = vpop.permute.xlu0 %1568 }
 0x1cf   : > { %v1477_v30 = vsel %vm2228_vm3, %v1473_v29, 0.0  ;;  %v1478_v56 = vsel %vm2216_vm2, %v1476_v40, 0.0 }
 0x1d0   : > { %v1436_v18 = vadd.f32 %v1434_v48, %v1420_v11  ;;  %v1486_v26 = vrot.slane %v1477_v30, %v2208_v53  ;;  %v1490_v39 = vrot.slane %v1478_v56, %v2208_v53  ;;  %v1502_v59 = vrot.slane %v1477_v30, %v2202_v50 }
 0x1d1   : > { %v1529_v9 = vpop.permute.xlu1 %1528  ;;  %v1506_v7 = vrot.slane %v1478_v56, %v2202_v50  ;;  %v1518_v14 = vrot.slane %v1477_v30, %v2224_v61  ;;  %v1522_v41 = vrot.slane %v1478_v56, %v2224_v61  ;;  %v1538_v36 = vrot.slane %v1478_v56, %v2244_v24 }
 0x1d2   : > { %v1452_v37 = vadd.f32 %v1450_v35, %v1436_v18  ;;  %v1491_v63 = vmul.f32 %v1486_v26, %v1481_v28  ;;  %v1492_v4 = vmul.f32 %v1490_v39, %v1481_v28  ;;  %v1507_v57 = vmul.f32 %v1502_v59, %v1497_v19  ;;  %v1585_v18 = vpop.permute.xlu0 %1584 }
 0x1d3   : > { %v1508_v44 = vmul.f32 %v1506_v7, %v1497_v19  ;;  %v1534_v28 = vrot.slane %v1477_v30, %v2244_v24  ;;  %v1523_v20 = vmul.f32 %v1518_v14, %v1513_v46  ;;  %v1524_v54 = vmul.f32 %v1522_v41, %v1513_v46 }
 0x1d4   : > { %v1468_v60 = vadd.f32 %v1466_v13, %v1452_v37  ;;  %v1493_v38 = vadd.f32 %v1491_v63, %v1467_v33  ;;  %v1540_v43 = vmul.f32 %v1538_v36, %v1529_v9 }
 0x1d5   : > { %v1539_v27 = vmul.f32 %v1534_v28, %v1529_v9 }
 0x1d6   : > { %v1553_v32 = vpop.permute.xlu1 %1552  ;;  %v1494_v23 = vadd.f32 %v1492_v4, %v1468_v60  ;;  %v1509_v31 = vadd.f32 %v1507_v57, %v1493_v38  ;;  %v1643_v52 = vpop.permute.xlu0 %1642 }
 0x1d8   : > { %v1510_v15 = vadd.f32 %v1508_v44, %v1494_v23  ;;  %v1525_v19 = vadd.f32 %v1523_v20, %v1509_v31 }
 0x1da   : > { %v1544_v58 = vpop.permute.xlu1 %1543  ;;  %v1526_v12 = vadd.f32 %v1524_v54, %v1510_v15  ;;  %v1541_v8 = vadd.f32 %v1539_v27, %v1525_v19  ;;  %v1659_v15 = vpop.permute.xlu0 %1658 }
 0x1dc   : > { %v1542_v16 = vadd.f32 %v1540_v43, %v1526_v12 }
 0x1de   : > { %v1546_v0 = vpop.permute.xlu1 %1545 }
 0x1df   : > { %v1547_v10 = vsel %vm881_vm12, %v1544_v58, %v1546_v0  ;;  %v1550_v49 = vsel %vm881_vm12, %v1546_v0, 0.0 }
 0x1e0   : > { %v1558_v51 = vrot.slane %v1547_v10, %v2208_v53  ;;  %v1562_v17 = vrot.slane %v1550_v49, %v2208_v53  ;;  %v1574_v45 = vrot.slane %v1547_v10, %v2202_v50  ;;  %v1578_v62 = vrot.slane %v1550_v49, %v2202_v50 }
 0x1e1   : > { %v1590_v25 = vrot.slane %v1547_v10, %v2224_v61  ;;  %v1594_v30 = vrot.slane %v1550_v49, %v2224_v61  ;;  %v1606_v9 = vrot.slane %v1547_v10, %v2244_v24  ;;  %v1610_v37 = vrot.slane %v1550_v49, %v2244_v24 }
 0x1e2   : > { %v1601_v42 = vpop.permute.xlu1 %1600  ;;  %v1563_v22 = vmul.f32 %v1558_v51, %v1553_v32  ;;  %v1564_v55 = vmul.f32 %v1562_v17, %v1553_v32  ;;  %v1579_v40 = vmul.f32 %v1574_v45, %v1569_v5  ;;  %v1580_v34 = vmul.f32 %v1578_v62, %v1569_v5 }
 0x1e3   : > { %v1595_v1 = vmul.f32 %v1590_v25, %v1585_v18  ;;  %v1596_v26 = vmul.f32 %v1594_v30, %v1585_v18  ;;  %v1611_v32 = vmul.f32 %v1606_v9, %v1601_v42  ;;  %v1612_v33 = vmul.f32 %v1610_v37, %v1601_v42 }
 0x1e4   : > { %v1565_v48 = vadd.f32 %v1563_v22, %v1541_v8  ;;  %v1566_v11 = vadd.f32 %v1564_v55, %v1542_v16  ;;  %v1938_v22 = vld [vmem:[%s2053_s8] sm:$0xff] }
 0x1e6   : > { %v1581_v35 = vadd.f32 %v1579_v40, %v1565_v48  ;;  %v1582_v56 = vadd.f32 %v1580_v34, %v1566_v11 }
 0x1e7   : > { %v1627_v29 = vpop.permute.xlu1 %1626 }
 0x1e8   : > { %v1597_v13 = vadd.f32 %v1595_v1, %v1581_v35  ;;  %v1598_v47 = vadd.f32 %v1596_v26, %v1582_v56 }
 0x1ea   : > { %v1613_v57 = vadd.f32 %v1611_v32, %v1597_v13  ;;  %v1614_v44 = vadd.f32 %v1612_v33, %v1598_v47 }
 0x1eb   : > { %v1616_v21 = vpop.permute.xlu1 %1615 }
 0x1ef   : > { %v1618_v39 = vpop.permute.xlu1 %1617 }
 0x1f0   : > { %v1619_v60 = vsel %vm954_vm13, %v1616_v21, %v1618_v39  ;;  %v1622_v63 = vsel %vm954_vm13, %v1618_v39, 0.0 }
 0x1f1   : > { %v1623_v4 = vsel %vm2289_vm8, %v1619_v60, 0.0  ;;  %v1624_v59 = vsel %vm2269_vm7, %v1622_v63, 0.0 }
 0x1f2   : > { %v1632_v7 = vrot.slane %v1623_v4, %v2208_v53  ;;  %v1636_v38 = vrot.slane %v1624_v59, %v2208_v53  ;;  %v1648_v23 = vrot.slane %v1623_v4, %v2202_v50  ;;  %v1652_v58 = vrot.slane %v1624_v59, %v2202_v50 }
 0x1f3   : > { %v1664_v46 = vrot.slane %v1623_v4, %v2224_v61  ;;  %v1668_v3 = vrot.slane %v1624_v59, %v2224_v61  ;;  %v1680_v31 = vrot.slane %v1623_v4, %v2244_v24  ;;  %v1684_v2 = vrot.slane %v1624_v59, %v2244_v24  ;;  %v1675_v20 = vpop.permute.xlu1 %1674 }
 0x1f4   : > { %v1637_v14 = vmul.f32 %v1632_v7, %v1627_v29  ;;  %v1638_v41 = vmul.f32 %v1636_v38, %v1627_v29  ;;  %v1653_v53 = vmul.f32 %v1648_v23, %v1643_v52  ;;  %v1654_v0 = vmul.f32 %v1652_v58, %v1643_v52 }
 0x1f5   : > { %v1669_v10 = vmul.f32 %v1664_v46, %v1659_v15  ;;  %v1670_v49 = vmul.f32 %v1668_v3, %v1659_v15  ;;  %v1685_v51 = vmul.f32 %v1680_v31, %v1675_v20  ;;  %v1686_v17 = vmul.f32 %v1684_v2, %v1675_v20 }
 0x1f6   : > { %v1639_v36 = vadd.f32 %v1637_v14, %v1613_v57  ;;  %v1640_v28 = vadd.f32 %v1638_v41, %v1614_v44 }
 0x1f8   : > { %v1655_v50 = vadd.f32 %v1653_v53, %v1639_v36  ;;  %v1656_v54 = vadd.f32 %v1654_v0, %v1640_v28  ;;  %v1692_v12 = vpop.permute.xlu1 %1691 }
 0x1fa   : > { %v1671_v19 = vadd.f32 %v1669_v10, %v1655_v50  ;;  %v1672_v61 = vadd.f32 %v1670_v49, %v1656_v54 }
 0x1fc   : > { %v1687_v42 = vadd.f32 %v1685_v51, %v1671_v19  ;;  %v1688_v27 = vadd.f32 %v1686_v17, %v1672_v61 }
 0x1fe   : > { %v1694_v24 = vadd.f32 %v1692_v12, %v1687_v42  ;;  %v1695_v43 = vadd.f32 %v1692_v12, %v1688_v27 }
 0x200   : > { %v1697_v55 = vadd.f32 %v1938_v22, %v1694_v24  ;;  %v1698_v5 = vadd.f32 %v1695_v43, %v2069_v6 }
 0x202   : > { %v1701_v8 = vcombine.low %v1697_v55, %v1698_v5 }
 0x204   : > { %1703 = vst [vmem:[%s291_s10] sm:$0xff] %v1701_v8 }
 0x205 PF: > { %s18_s24 = sadd.s32 1, %s1945_s24  }
 0x206   : > { %p15_p4 = scmp.ge.s32.totalorder %s18_s24, 4  }
 0x208   :  { %17 = sbr.rel (!%p15_p4) target bundleno = 1 (0x1), region = 86 }

</bundles_post_ra>
